<compile_context>
chip_gen: v6e
topology: v6e:2x2x1
jax: 0.10.0
libtpu: 0.0.40
codegen_flags: <defaults>
</compile_context>

<pallas_src>
import functools

import jax
import jax.numpy as jnp
from jax.experimental import pallas as pl
from jax.experimental.pallas import tpu as pltpu

BN_EPS = 1e-5      # nn.BatchNorm1d default eps
NORM_EPS = 1e-12   # F.normalize default eps


# ----------------------------------------------------------------------------
# Fused kernel: Linear(no bias) + BatchNorm1d(affine=False, batch stats) +
# F.normalize(dim=0) for BOTH branches, plus full in-kernel loss finalization.
# Tiled over the output-feature dimension; each step loads one W^T slab.
# Scratch accumulators (Gram matrices + diagonal stats) persist across steps.
# ----------------------------------------------------------------------------
def _barlow_kernel(f1_ref, f2_ref, wt_ref, loss_ref,
                   g1_ref, g2_ref, inv_ref, dsq_ref, *, batch, lambd):
    j = pl.program_id(0)

    @pl.when(j == 0)
    def _():
        g1_ref[...] = jnp.zeros_like(g1_ref)
        g2_ref[...] = jnp.zeros_like(g2_ref)
        inv_ref[...] = jnp.zeros_like(inv_ref)
        dsq_ref[...] = jnp.zeros_like(dsq_ref)

    w = wt_ref[...]                                                   # (D_IN, TN)
    z1 = jnp.dot(f1_ref[...], w, preferred_element_type=jnp.float32)  # (B, TN)
    z2 = jnp.dot(f2_ref[...], w, preferred_element_type=jnp.float32)  # (B, TN)

    def bn_normalize(z):
        # BatchNorm1d training mode: biased batch variance, eps=1e-5, no affine.
        mean = jnp.mean(z, axis=0, keepdims=True)
        var = jnp.mean(jnp.square(z - mean), axis=0, keepdims=True)
        xhat = (z - mean) * jax.lax.rsqrt(var + BN_EPS)
        # F.normalize(dim=0): x / max(||col||, eps)  ==  x * rsqrt(max(||col||^2, eps^2))
        sumsq = jnp.sum(xhat * xhat, axis=0, keepdims=True)
        inv_norm = jax.lax.rsqrt(jnp.maximum(sumsq, NORM_EPS * NORM_EPS))
        return xhat * inv_norm

    x1 = bn_normalize(z1)                                             # (B, TN)
    x2 = bn_normalize(z2)                                             # (B, TN)

    # diag(cc) restricted to this column tile: colsum(x1*x2)/B.
    d = jnp.sum(x1 * x2, axis=0, keepdims=True) * (1.0 / batch)       # (1, TN)
    inv_ref[...] += jnp.sum(jnp.square(d - 1.0), axis=1, keepdims=True)
    dsq_ref[...] += jnp.sum(d * d, axis=1, keepdims=True)

    # Partial Gram matrices (contraction over this tile's feature columns).
    g1_ref[...] += jax.lax.dot_general(
        x1, x1, dimension_numbers=(((1,), (1,)), ((), ())),
        preferred_element_type=jnp.float32)
    g2_ref[...] += jax.lax.dot_general(
        x2, x2, dimension_numbers=(((1,), (1,)), ((), ())),
        preferred_element_type=jnp.float32)

    @pl.when(j == pl.num_programs(0) - 1)
    def _():
        # sum(cc^2) = sum(G1 * G2) / B^2  (cc itself never built).
        prod = g1_ref[...] * g2_ref[...]                              # (B, B)
        sum_cc2 = jnp.sum(jnp.sum(prod, axis=1, keepdims=True),
                          axis=0, keepdims=True) * (1.0 / (batch * batch))
        redundancy = sum_cc2 - dsq_ref[...]                           # off-diag^2 sum
        loss_ref[...] = inv_ref[...] + lambd * redundancy


@functools.partial(jax.jit, static_argnames=("lambd", "tn"))
def barlow_twins_forward(features1, features2, wt, *, lambd, tn=512):
    """Full BarlowTwins forward: returns the scalar loss.

    features1/features2: (B, D_IN) float32
    wt: projector weight stored pre-transposed as W^T with shape (D_IN, D_OUT)
    """
    B, d_in = features1.shape
    d_out = wt.shape[1]
    assert d_out % tn == 0, "d_out must be divisible by the feature tile"
    assert B % 8 == 0, "batch must be a multiple of the f32 sublane (8)"
    nt = d_out // tn  # tn=512 -> 4 steps: keeps W^T DMA overlapped with compute

    kernel = functools.partial(_barlow_kernel, batch=B, lambd=lambd)
    loss = pl.pallas_call(
        kernel,
        out_shape=jax.ShapeDtypeStruct((1, 1), jnp.float32),
        grid=(nt,),
        in_specs=[
            pl.BlockSpec((B, d_in), lambda j: (0, 0)),   # resident in VMEM
            pl.BlockSpec((B, d_in), lambda j: (0, 0)),   # resident in VMEM
            pl.BlockSpec((d_in, tn), lambda j: (0, j)),  # streamed W^T slab
        ],
        out_specs=pl.BlockSpec((1, 1), lambda j: (0, 0)),
        scratch_shapes=[
            pltpu.VMEM((B, B), jnp.float32),   # G1 accumulator
            pltpu.VMEM((B, B), jnp.float32),   # G2 accumulator
            pltpu.VMEM((1, 1), jnp.float32),   # sum((d-1)^2)
            pltpu.VMEM((1, 1), jnp.float32),   # sum(d^2)
        ],
        compiler_params=pltpu.CompilerParams(
            dimension_semantics=("arbitrary",)),
    )(features1, features2, wt)
    return loss[0, 0]


# ----------------------------------------------------------------------------
# Pure-JAX reference (for correctness check only; builds cc explicitly).
# ----------------------------------------------------------------------------
def reference(features1, features2, wt, lambd):
    def branch(f):
        z = f @ wt
        mean = z.mean(axis=0, keepdims=True)
        var = ((z - mean) ** 2).mean(axis=0, keepdims=True)
        xhat = (z - mean) / jnp.sqrt(var + BN_EPS)
        norm = jnp.sqrt(jnp.sum(xhat * xhat, axis=0, keepdims=True))
        return xhat / jnp.maximum(norm, NORM_EPS)

    x1 = branch(features1)
    x2 = branch(features2)
    B = features1.shape[0]
    cc = (x1.T @ x2) / B
    dd = jnp.diagonal(cc)
    invariance = jnp.sum((dd - 1.0) ** 2)
    redundancy = jnp.sum(cc * cc) - jnp.sum(dd * dd)
    return invariance + lambd * redundancy


if __name__ == "__main__":
    B, D_IN, D_OUT = 8, 512, 2048
    LAMBD = 0.005

    key = jax.random.PRNGKey(0)
    k1, k2, kw = jax.random.split(key, 3)
    features1 = jax.random.normal(k1, (B, D_IN), dtype=jnp.float32)
    features2 = jax.random.normal(k2, (B, D_IN), dtype=jnp.float32)

    # Deterministic Linear(512, 2048, bias=False) weight, stored as W^T.
    bound = 1.0 / (D_IN ** 0.5)
    w = jax.random.uniform(kw, (D_OUT, D_IN), dtype=jnp.float32,
                           minval=-bound, maxval=bound)
    wt = jnp.asarray(w.T)  # (D_IN, D_OUT)

    loss = jax.block_until_ready(
        barlow_twins_forward(features1, features2, wt, lambd=LAMBD))

    loss_ref = jax.block_until_ready(
        reference(features1, features2, wt, LAMBD))

    rel_err = abs(float(loss) - float(loss_ref)) / max(abs(float(loss_ref)), 1e-6)
    assert rel_err < 1e-4, f"mismatch: pallas={loss}, ref={loss_ref}"

    print("KERNEL_OK")
</pallas_src>

<mosaic_0001>
module attributes {stable_mosaic.version = 11 : i64} {
  func.func @_barlow_kernel(%arg0: i32, %arg1: memref<8x512xf32, #tpu.memory_space<vmem>>, %arg2: memref<8x512xf32, #tpu.memory_space<vmem>>, %arg3: memref<512x512xf32, #tpu.memory_space<vmem>>, %arg4: memref<1x1xf32, #tpu.memory_space<vmem>>, %arg5: memref<8x8xf32, #tpu.memory_space<vmem>>, %arg6: memref<8x8xf32, #tpu.memory_space<vmem>>, %arg7: memref<1x1xf32, #tpu.memory_space<vmem>>, %arg8: memref<1x1xf32, #tpu.memory_space<vmem>>) attributes {dimension_semantics = [#tpu.dimension_semantics<arbitrary>], iteration_bounds = array<i64: 4>, scalar_prefetch = 0 : i64, scratch_operands = 4 : i64, tpu.core_type = #tpu.core_type<tc>, window_params = [{pipeline_mode = #tpu.pipeline_mode<synchronous>, transform_indices = @transform_0, window_bounds = array<i64: 8, 512>}, {pipeline_mode = #tpu.pipeline_mode<synchronous>, transform_indices = @transform_1, window_bounds = array<i64: 8, 512>}, {transform_indices = @transform_2, window_bounds = array<i64: 512, 512>}, {pipeline_mode = #tpu.pipeline_mode<synchronous>, transform_indices = @transform_3, window_bounds = array<i64: 1, 1>}]} {
    %c0_i32 = arith.constant 0 : i32
    %0 = arith.cmpi eq, %arg0, %c0_i32 : i32
    %1 = arith.extui %0 : i1 to i32
    %c0_i32_0 = arith.constant 0 : i32
    %2 = arith.cmpi ne, %1, %c0_i32_0 : i32
    scf.if %2 {
      %cst_45 = arith.constant 0.000000e+00 : f32
      %90 = vector.broadcast %cst_45 : f32 to vector<8x8xf32>
      %c0_46 = arith.constant 0 : index
      %c0_47 = arith.constant 0 : index
      %91 = vector.load %arg5[%c0_46, %c0_47] : memref<8x8xf32, #tpu.memory_space<vmem>>, vector<8x8xf32>
      tpu.vector_store %arg5[%c0_46, %c0_47], %90 {strides = array<i32>} : memref<8x8xf32, #tpu.memory_space<vmem>>, vector<8x8xf32>,
      %cst_48 = arith.constant 0.000000e+00 : f32
      %92 = vector.broadcast %cst_48 : f32 to vector<8x8xf32>
      %c0_49 = arith.constant 0 : index
      %c0_50 = arith.constant 0 : index
      %93 = vector.load %arg6[%c0_49, %c0_50] : memref<8x8xf32, #tpu.memory_space<vmem>>, vector<8x8xf32>
      tpu.vector_store %arg6[%c0_49, %c0_50], %92 {strides = array<i32>} : memref<8x8xf32, #tpu.memory_space<vmem>>, vector<8x8xf32>,
      %cst_51 = arith.constant 0.000000e+00 : f32
      %94 = vector.broadcast %cst_51 : f32 to vector<1x1xf32>
      %c0_52 = arith.constant 0 : index
      %c0_53 = arith.constant 0 : index
      %95 = vector.load %arg7[%c0_52, %c0_53] : memref<1x1xf32, #tpu.memory_space<vmem>>, vector<1x1xf32>
      tpu.vector_store %arg7[%c0_52, %c0_53], %94 {strides = array<i32>} : memref<1x1xf32, #tpu.memory_space<vmem>>, vector<1x1xf32>,
      %cst_54 = arith.constant 0.000000e+00 : f32
      %96 = vector.broadcast %cst_54 : f32 to vector<1x1xf32>
      %c0_55 = arith.constant 0 : index
      %c0_56 = arith.constant 0 : index
      %97 = vector.load %arg8[%c0_55, %c0_56] : memref<1x1xf32, #tpu.memory_space<vmem>>, vector<1x1xf32>
      tpu.vector_store %arg8[%c0_55, %c0_56], %96 {strides = array<i32>} : memref<1x1xf32, #tpu.memory_space<vmem>>, vector<1x1xf32>,
    } else {
    }
    %c0 = arith.constant 0 : index
    %c0_1 = arith.constant 0 : index
    %3 = vector.load %arg3[%c0, %c0_1] : memref<512x512xf32, #tpu.memory_space<vmem>>, vector<512x512xf32>
    %c0_2 = arith.constant 0 : index
    %c0_3 = arith.constant 0 : index
    %4 = vector.load %arg1[%c0_2, %c0_3] : memref<8x512xf32, #tpu.memory_space<vmem>>, vector<8x512xf32>
    %cst = arith.constant dense<0.000000e+00> : vector<8x512xf32>
    %5 = tpu.matmul %4, %3, %cst {dimension_numbers = #tpu.dot_dimension_numbers<[1], [0], [0], [1], [0, 0, 1, 1], [], []>} : vector<8x512xf32>, vector<512x512xf32>, vector<8x512xf32> -> vector<8x512xf32>
    %c0_4 = arith.constant 0 : index
    %c0_5 = arith.constant 0 : index
    %6 = vector.load %arg2[%c0_4, %c0_5] : memref<8x512xf32, #tpu.memory_space<vmem>>, vector<8x512xf32>
    %cst_6 = arith.constant dense<0.000000e+00> : vector<8x512xf32>
    %7 = tpu.matmul %6, %3, %cst_6 {dimension_numbers = #tpu.dot_dimension_numbers<[1], [0], [0], [1], [0, 0, 1, 1], [], []>} : vector<8x512xf32>, vector<512x512xf32>, vector<8x512xf32> -> vector<8x512xf32>
    %cst_7 = arith.constant dense<0.000000e+00> : vector<512xf32>
    %8 = vector.multi_reduction <add>, %5, %cst_7 [0] : vector<8x512xf32> to vector<512xf32>
    %9 = vector.shape_cast %8 : vector<512xf32> to vector<1x512xf32>
    %cst_8 = arith.constant 8.000000e+00 : f32
    %10 = vector.broadcast %cst_8 : f32 to vector<1x512xf32>
    %11 = arith.divf %9, %10 : vector<1x512xf32>
    %12 = vector.broadcast %11 : vector<1x512xf32> to vector<8x512xf32>
    %13 = arith.subf %5, %12 : vector<8x512xf32>
    %14 = arith.mulf %13, %13 : vector<8x512xf32>
    %cst_9 = arith.constant dense<0.000000e+00> : vector<512xf32>
    %15 = vector.multi_reduction <add>, %14, %cst_9 [0] : vector<8x512xf32> to vector<512xf32>
    %16 = vector.shape_cast %15 : vector<512xf32> to vector<1x512xf32>
    %cst_10 = arith.constant 8.000000e+00 : f32
    %17 = vector.broadcast %cst_10 : f32 to vector<1x512xf32>
    %18 = arith.divf %16, %17 : vector<1x512xf32>
    %19 = vector.broadcast %11 : vector<1x512xf32> to vector<8x512xf32>
    %20 = arith.subf %5, %19 : vector<8x512xf32>
    %cst_11 = arith.constant 9.99999974E-6 : f32
    %21 = vector.broadcast %cst_11 : f32 to vector<1x512xf32>
    %22 = arith.addf %18, %21 : vector<1x512xf32>
    %23 = math.rsqrt %22 : vector<1x512xf32>
    %24 = vector.broadcast %23 : vector<1x512xf32> to vector<8x512xf32>
    %25 = arith.mulf %20, %24 : vector<8x512xf32>
    %26 = arith.mulf %25, %25 : vector<8x512xf32>
    %cst_12 = arith.constant dense<0.000000e+00> : vector<512xf32>
    %27 = vector.multi_reduction <add>, %26, %cst_12 [0] : vector<8x512xf32> to vector<512xf32>
    %28 = vector.shape_cast %27 : vector<512xf32> to vector<1x512xf32>
    %cst_13 = arith.constant 1.000000e-24 : f32
    %29 = vector.broadcast %cst_13 : f32 to vector<1x512xf32>
    %30 = arith.maximumf %28, %29 : vector<1x512xf32>
    %31 = math.rsqrt %30 : vector<1x512xf32>
    %32 = vector.broadcast %31 : vector<1x512xf32> to vector<8x512xf32>
    %33 = arith.mulf %25, %32 : vector<8x512xf32>
    %cst_14 = arith.constant dense<0.000000e+00> : vector<512xf32>
    %34 = vector.multi_reduction <add>, %7, %cst_14 [0] : vector<8x512xf32> to vector<512xf32>
    %35 = vector.shape_cast %34 : vector<512xf32> to vector<1x512xf32>
    %cst_15 = arith.constant 8.000000e+00 : f32
    %36 = vector.broadcast %cst_15 : f32 to vector<1x512xf32>
    %37 = arith.divf %35, %36 : vector<1x512xf32>
    %38 = vector.broadcast %37 : vector<1x512xf32> to vector<8x512xf32>
    %39 = arith.subf %7, %38 : vector<8x512xf32>
    %40 = arith.mulf %39, %39 : vector<8x512xf32>
    %cst_16 = arith.constant dense<0.000000e+00> : vector<512xf32>
    %41 = vector.multi_reduction <add>, %40, %cst_16 [0] : vector<8x512xf32> to vector<512xf32>
    %42 = vector.shape_cast %41 : vector<512xf32> to vector<1x512xf32>
    %cst_17 = arith.constant 8.000000e+00 : f32
    %43 = vector.broadcast %cst_17 : f32 to vector<1x512xf32>
    %44 = arith.divf %42, %43 : vector<1x512xf32>
    %45 = vector.broadcast %37 : vector<1x512xf32> to vector<8x512xf32>
    %46 = arith.subf %7, %45 : vector<8x512xf32>
    %cst_18 = arith.constant 9.99999974E-6 : f32
    %47 = vector.broadcast %cst_18 : f32 to vector<1x512xf32>
    %48 = arith.addf %44, %47 : vector<1x512xf32>
    %49 = math.rsqrt %48 : vector<1x512xf32>
    %50 = vector.broadcast %49 : vector<1x512xf32> to vector<8x512xf32>
    %51 = arith.mulf %46, %50 : vector<8x512xf32>
    %52 = arith.mulf %51, %51 : vector<8x512xf32>
    %cst_19 = arith.constant dense<0.000000e+00> : vector<512xf32>
    %53 = vector.multi_reduction <add>, %52, %cst_19 [0] : vector<8x512xf32> to vector<512xf32>
    %54 = vector.shape_cast %53 : vector<512xf32> to vector<1x512xf32>
    %cst_20 = arith.constant 1.000000e-24 : f32
    %55 = vector.broadcast %cst_20 : f32 to vector<1x512xf32>
    %56 = arith.maximumf %54, %55 : vector<1x512xf32>
    %57 = math.rsqrt %56 : vector<1x512xf32>
    %58 = vector.broadcast %57 : vector<1x512xf32> to vector<8x512xf32>
    %59 = arith.mulf %51, %58 : vector<8x512xf32>
    %60 = arith.mulf %33, %59 : vector<8x512xf32>
    %cst_21 = arith.constant dense<0.000000e+00> : vector<512xf32>
    %61 = vector.multi_reduction <add>, %60, %cst_21 [0] : vector<8x512xf32> to vector<512xf32>
    %62 = vector.shape_cast %61 : vector<512xf32> to vector<1x512xf32>
    %cst_22 = arith.constant 1.250000e-01 : f32
    %63 = vector.broadcast %cst_22 : f32 to vector<1x512xf32>
    %64 = arith.mulf %62, %63 : vector<1x512xf32>
    %c0_23 = arith.constant 0 : index
    %c0_24 = arith.constant 0 : index
    %65 = vector.load %arg7[%c0_23, %c0_24] : memref<1x1xf32, #tpu.memory_space<vmem>>, vector<1x1xf32>
    %cst_25 = arith.constant 1.000000e+00 : f32
    %66 = vector.broadcast %cst_25 : f32 to vector<1x512xf32>
    %67 = arith.subf %64, %66 : vector<1x512xf32>
    %68 = arith.mulf %67, %67 : vector<1x512xf32>
    %cst_26 = arith.constant dense<0.000000e+00> : vector<1xf32>
    %69 = vector.multi_reduction <add>, %68, %cst_26 [1] : vector<1x512xf32> to vector<1xf32>
    %70 = vector.shape_cast %69 : vector<1xf32> to vector<1x1xf32>
    %71 = arith.addf %65, %70 : vector<1x1xf32>
    %c0_27 = arith.constant 0 : index
    %c0_28 = arith.constant 0 : index
    %72 = vector.load %arg7[%c0_27, %c0_28] : memref<1x1xf32, #tpu.memory_space<vmem>>, vector<1x1xf32>
    tpu.vector_store %arg7[%c0_27, %c0_28], %71 {strides = array<i32>} : memref<1x1xf32, #tpu.memory_space<vmem>>, vector<1x1xf32>,
    %c0_29 = arith.constant 0 : index
    %c0_30 = arith.constant 0 : index
    %73 = vector.load %arg8[%c0_29, %c0_30] : memref<1x1xf32, #tpu.memory_space<vmem>>, vector<1x1xf32>
    %74 = arith.mulf %64, %64 : vector<1x512xf32>
    %cst_31 = arith.constant dense<0.000000e+00> : vector<1xf32>
    %75 = vector.multi_reduction <add>, %74, %cst_31 [1] : vector<1x512xf32> to vector<1xf32>
    %76 = vector.shape_cast %75 : vector<1xf32> to vector<1x1xf32>
    %77 = arith.addf %73, %76 : vector<1x1xf32>
    %c0_32 = arith.constant 0 : index
    %c0_33 = arith.constant 0 : index
    %78 = vector.load %arg8[%c0_32, %c0_33] : memref<1x1xf32, #tpu.memory_space<vmem>>, vector<1x1xf32>
    tpu.vector_store %arg8[%c0_32, %c0_33], %77 {strides = array<i32>} : memref<1x1xf32, #tpu.memory_space<vmem>>, vector<1x1xf32>,
    %c0_34 = arith.constant 0 : index
    %c0_35 = arith.constant 0 : index
    %79 = vector.load %arg5[%c0_34, %c0_35] : memref<8x8xf32, #tpu.memory_space<vmem>>, vector<8x8xf32>
    %cst_36 = arith.constant dense<0.000000e+00> : vector<8x8xf32>
    %80 = tpu.matmul %33, %33, %cst_36 {dimension_numbers = #tpu.dot_dimension_numbers<[1], [1], [0], [0], [0, 0, 1, 0], [], []>} : vector<8x512xf32>, vector<8x512xf32>, vector<8x8xf32> -> vector<8x8xf32>
    %81 = arith.addf %79, %80 : vector<8x8xf32>
    %c0_37 = arith.constant 0 : index
    %c0_38 = arith.constant 0 : index
    %82 = vector.load %arg5[%c0_37, %c0_38] : memref<8x8xf32, #tpu.memory_space<vmem>>, vector<8x8xf32>
    tpu.vector_store %arg5[%c0_37, %c0_38], %81 {strides = array<i32>} : memref<8x8xf32, #tpu.memory_space<vmem>>, vector<8x8xf32>,
    %c0_39 = arith.constant 0 : index
    %c0_40 = arith.constant 0 : index
    %83 = vector.load %arg6[%c0_39, %c0_40] : memref<8x8xf32, #tpu.memory_space<vmem>>, vector<8x8xf32>
    %cst_41 = arith.constant dense<0.000000e+00> : vector<8x8xf32>
    %84 = tpu.matmul %59, %59, %cst_41 {dimension_numbers = #tpu.dot_dimension_numbers<[1], [1], [0], [0], [0, 0, 1, 0], [], []>} : vector<8x512xf32>, vector<8x512xf32>, vector<8x8xf32> -> vector<8x8xf32>
    %85 = arith.addf %83, %84 : vector<8x8xf32>
    %c0_42 = arith.constant 0 : index
    %c0_43 = arith.constant 0 : index
    %86 = vector.load %arg6[%c0_42, %c0_43] : memref<8x8xf32, #tpu.memory_space<vmem>>, vector<8x8xf32>
    tpu.vector_store %arg6[%c0_42, %c0_43], %85 {strides = array<i32>} : memref<8x8xf32, #tpu.memory_space<vmem>>, vector<8x8xf32>,
    %c3_i32 = arith.constant 3 : i32
    %87 = arith.cmpi eq, %arg0, %c3_i32 : i32
    %88 = arith.extui %87 : i1 to i32
    %c0_i32_44 = arith.constant 0 : i32
    %89 = arith.cmpi ne, %88, %c0_i32_44 : i32
    scf.if %89 {
      %c0_45 = arith.constant 0 : index
      %c0_46 = arith.constant 0 : index
      %90 = vector.load %arg5[%c0_45, %c0_46] : memref<8x8xf32, #tpu.memory_space<vmem>>, vector<8x8xf32>
      %c0_47 = arith.constant 0 : index
      %c0_48 = arith.constant 0 : index
      %91 = vector.load %arg6[%c0_47, %c0_48] : memref<8x8xf32, #tpu.memory_space<vmem>>, vector<8x8xf32>
      %92 = arith.mulf %90, %91 : vector<8x8xf32>
      %cst_49 = arith.constant dense<0.000000e+00> : vector<8xf32>
      %93 = vector.multi_reduction <add>, %92, %cst_49 [1] : vector<8x8xf32> to vector<8xf32>
      %94 = vector.shape_cast %93 : vector<8xf32> to vector<8x1xf32>
      %cst_50 = arith.constant dense<0.000000e+00> : vector<1xf32>
      %95 = vector.multi_reduction <add>, %94, %cst_50 [0] : vector<8x1xf32> to vector<1xf32>
      %96 = vector.shape_cast %95 : vector<1xf32> to vector<1x1xf32>
      %cst_51 = arith.constant 1.562500e-02 : f32
      %97 = vector.broadcast %cst_51 : f32 to vector<1x1xf32>
      %98 = arith.mulf %96, %97 : vector<1x1xf32>
      %c0_52 = arith.constant 0 : index
      %c0_53 = arith.constant 0 : index
      %99 = vector.load %arg8[%c0_52, %c0_53] : memref<1x1xf32, #tpu.memory_space<vmem>>, vector<1x1xf32>
      %100 = arith.subf %98, %99 : vector<1x1xf32>
      %c0_54 = arith.constant 0 : index
      %c0_55 = arith.constant 0 : index
      %101 = vector.load %arg7[%c0_54, %c0_55] : memref<1x1xf32, #tpu.memory_space<vmem>>, vector<1x1xf32>
      %cst_56 = arith.constant 5.000000e-03 : f32
      %102 = vector.broadcast %cst_56 : f32 to vector<1x1xf32>
      %103 = arith.mulf %102, %100 : vector<1x1xf32>
      %104 = arith.addf %101, %103 : vector<1x1xf32>
      %c0_57 = arith.constant 0 : index
      %c0_58 = arith.constant 0 : index
      %105 = vector.load %arg4[%c0_57, %c0_58] : memref<1x1xf32, #tpu.memory_space<vmem>>, vector<1x1xf32>
      tpu.vector_store %arg4[%c0_57, %c0_58], %104 {strides = array<i32>} : memref<1x1xf32, #tpu.memory_space<vmem>>, vector<1x1xf32>,
    } else {
    }
    return
  }
  func.func @transform_0(%arg0: i32) -> (i32, i32) {
    %c0_i32 = arith.constant 0 : i32
    %c0_i32_0 = arith.constant 0 : i32
    %c0_i32_1 = arith.constant 0 : i32
    return %c0_i32, %c0_i32_0 : i32, i32
  }
  func.func @transform_1(%arg0: i32) -> (i32, i32) {
    %c0_i32 = arith.constant 0 : i32
    %c0_i32_0 = arith.constant 0 : i32
    %c0_i32_1 = arith.constant 0 : i32
    return %c0_i32, %c0_i32_0 : i32, i32
  }
  func.func @transform_2(%arg0: i32) -> (i32, i32) {
    %c0_i32 = arith.constant 0 : i32
    %c0_i32_0 = arith.constant 0 : i32
    return %c0_i32, %arg0 : i32, i32
  }
  func.func @transform_3(%arg0: i32) -> (i32, i32) {
    %c0_i32 = arith.constant 0 : i32
    %c0_i32_0 = arith.constant 0 : i32
    %c0_i32_1 = arith.constant 0 : i32
    return %c0_i32, %c0_i32_0 : i32, i32
  }
}

</mosaic_0001>

<bundles_post_ra>
// kernel: barlow_twins_forward.1
= control target key start
LH: loop header
LB: loop body
LE: loop exit
PB: predicated region body
PF: predicated region fallthrough
CT: control target
= control target key end

     0   :  { %8 = vsyncpa [#allocation7], 0  ;;  %s3493_s0 = inlined_call_operand.hbm [shape: f32[8,512], index: 0, kind: input, shape index: {}]   ;;  %s3494_s1 = inlined_call_operand.hbm [shape: f32[8,512], index: 1, kind: input, shape index: {}]   ;;  %s3495_s2 = inlined_call_operand.hbm [shape: f32[512,2048], index: 2, kind: input, shape index: {}]   ;;  %s3496_s3 = inlined_call_operand.hbm [shape: f32[1,1], index: 3, kind: output, shape index: {}]  }
   0x1   :  { %9 = vsyncpa [#allocation10], 0 }
   0x2   :  { %10 = vsyncpa [#allocation8], 0  ;;  %s2047_s12 = smov 0   ;;  %s2049_s13 = smov 0  }
   0x3   :  { %s2051_s14 = smov 0   ;;  %s2053_s15 = smov 0  }
   0x4 LB: > { %s2066_s16 = sadd.s32 4294967295, %s2017_s15   ;;  %s2069_s17 = sadd.s32 1, %s2017_s15   ;;  %s2017_s15 = sphi %s2053_s15, %s4069_s15   ;;  %s2013_s14 = sphi %s2051_s14, %s4068_s14   ;;  %s2009_s13 = sphi %s2049_s13, %s4067_s13   ;;  %s2005_s12 = sphi %s2047_s12, %s4066_s12  }
   0x5   : > { %s62_s18 = ssub.s32 %s2017_s15, %s2069_s17  ;;  %s65_s19 = sadd.s32 1, %s2013_s14 }
   0x6   : > { %p63_p0 = scmp.eq.s32.totalorder %s62_s18, 0  ;;  %p72_p1 = scmp.ne.s32.totalorder %s2013_s14, %s2009_s13 }
   0x7   : > { %p73_p2 = scmp.eq.s32.totalorder %s2017_s15, 0  ;;  %p78_p3 = scmp.ne.s32.totalorder %s2009_s13, %s2005_s12 }
   0x8   : > { %s2079_s20 = scalar_select %p63_p0, %s2013_s14, %s65_s19  }
   0x9   : > { %p2081_p4 = por %p73_p2, %p72_p1  ;;  %p3497_p5 = scmp.eq.s32.totalorder %s2066_s16, 0 }
   0xa   : > { %p1724_p6 = scmp.ge.s32.totalorder %s2017_s15, 1  ;;  %p110_p7 = scmp.lt.s32.totalorder %s2017_s15, 5 }
   0xb   : > { %p2090_p8 = por %p3497_p5, %p78_p3  ;;  %s2019_s24 = smov [#allocation6]  }
   0xc   : > { %p2095_p10 = pnand %p1724_p6, %p110_p7  ;;  %s123_s25 = sshll.u32 %s2019_s24, 4  ;;  %s124_s25 = int_to_ptr.vmem [resolvable:$true] %s123_s25 }
   0xd   : > { %s3686_s22 = scalar_select %p2090_p8, 1, 0 }
   0xe   : > { %s3687_s23 = scalar_select %p2095_p10, 1, 0 }
   0xf   : > { %p1760_p11 = pneg %p2095_p10  ;;  %p1773_p12 = scmp.lt.s32.totalorder %s2017_s15, 4 }
  0x10   : > { %s2020_s27 = smov [#allocation9]   ;;  %s145_s30 = sand.u32 1, %s2017_s15  }
  0x11   : > { %p2104_p13 = pnand %p1760_p11, %p3497_p5  ;;  %s134_s28 = sshll.u32 %s2020_s27, 4  ;;  %s135_s28 = int_to_ptr.vmem [resolvable:$true] %s134_s28 }
  0x12   : > { %p2110_p0 = pnand %p1773_p12, %p2081_p4  ;;  %s1878_s4 = scalar_lea.vmem %s124_s25, 512 }
  0x13   : > { %p1869_p1 = pneg %p2104_p13  ;;  %p1879_p2 = scmp.ne.s32.totalorder %s124_s25, %s1878_s4 }
  0x14   : > { %s3689_s29 = scalar_select %p2110_p0, 1, 0 }
  0x15   : > { %p1881_p3 = pnand %p1879_p2, %p1869_p1  ;;  %p1886_p7 = scmp.lt.s32.totalorder %s124_s25, %s124_s25 }
  0x16   : > { %p1887_p11 = scmp.lt.s32.totalorder %s1878_s4, %s1878_s4 }
  0x17   : > { %p1882_p6 = pneg %p1881_p3 }
  0x18   : > { %p1888_p9 = por %p1887_p11, %p1886_p7 }
  0x1a   : > { %p1889_p5 = pnand %p1888_p9, %p1882_p6 }
  0x1c   : > { %1892 = shalt.err (!%p1889_p5)
}
  0x1d   : > { %1763 = dma.hbm_to_vmem [thread:$0]  (!%p2104_p13), %s3493_s0, 512, %s124_s25, [#allocation7]  }
  0x1e   : > { %s1904_s7 = scalar_lea.vmem %s135_s28, 512  ;;  %p1912_p2 = scmp.lt.s32.totalorder %s135_s28, %s135_s28 }
  0x1f   : > { %p1905_p4 = scmp.ne.s32.totalorder %s135_s28, %s1904_s7  ;;  %p1913_p3 = scmp.lt.s32.totalorder %s1904_s7, %s1904_s7 }
  0x21   : > { %p1907_p12 = pnand %p1905_p4, %p1869_p1  ;;  %p1914_p10 = por %p1913_p3, %p1912_p2 }
  0x23   : > { %p1908_p8 = pneg %p1907_p12 }
  0x25   : > { %p1915_p0 = pnand %p1914_p10, %p1908_p8 }
  0x27   : > { %1918 = shalt.err (!%p1915_p0)
}
  0x28   : > { %1766 = dma.hbm_to_vmem [thread:$0]  (!%p2104_p13), %s3494_s1, 512, %s135_s28, [#allocation10]  }
  0x29   : > { %s147_s10 = sand.u32 1, %s2013_s14   ;;  %s1745_s11 = sshll.u32 %s2017_s15, 9 }
  0x2a   : > { %s1728_s12 = sshll.u32 %s147_s10, 11  ;;  %s2138_s21 = scalar_lea.hbm %s3495_s2, %s1745_s11 }
  0x2b   : > { %s149_s24 = scalar_lea.vmem [#allocation11], %s1728_s12  ;;  %s2142_s26 = scalar_lea.sflag [#allocation7], %s145_s30 }
  0x2c   : > { %s156_s25 = sshll.u32 %s149_s24, 4  ;;  %s1919_s27 = scalar_lea.hbm %s2138_s21, 32768  ;;  %s2140_s25 = int_to_ptr.vmem [resolvable:$true] %s156_s25 }
  0x2d   : > { %p1920_p5 = scmp.ne.s32.totalorder %s2138_s21, %s1919_s27  ;;  %p3690_p8 = scmp.ne.s32.totalorder %s3689_s29, 0 }
  0x2e   : > { %s1924_s4 = scalar_lea.hbm %s3495_s2, 131072  ;;  %p1925_p0 = scmp.lt.s32.totalorder %s2138_s21, %s3495_s2 }
  0x2f   : > { %p1921_p9 = pneg %p3690_p8  ;;  %p1926_p1 = scmp.lt.s32.totalorder %s1924_s4, %s1919_s27 }
  0x31   : > { %p1922_p10 = pnand %p1921_p9, %p1920_p5  ;;  %p1927_p6 = por %p1926_p1, %p1925_p0 }
  0x33   : > { %p1923_p13 = pneg %p1922_p10 }
  0x35   : > { %p1928_p7 = pnand %p1927_p6, %p1923_p13 }
  0x37   : > { %1931 = shalt.err (!%p1928_p7)
}
  0x38   : > { %s1932_s30 = scalar_lea.vmem %s2140_s25, 32768  ;;  %s2021_s7 = smov [#allocation11]  }
  0x39   : > { %p1933_p11 = scmp.ne.s32.totalorder %s2140_s25, %s1932_s30  ;;  %s1937_s8 = sshll.u32 %s2021_s7, 4  ;;  %s1938_s8 = int_to_ptr.vmem [resolvable:$false] %s1937_s8 }
  0x3a   : > { %s1939_s9 = scalar_lea.vmem %s1938_s8, 65536  ;;  %p1940_p2 = scmp.lt.s32.totalorder %s2140_s25, %s1938_s8 }
  0x3b   : > { %p1935_p4 = pnand %p1933_p11, %p1921_p9  ;;  %p1941_p3 = scmp.lt.s32.totalorder %s1939_s9, %s1932_s30 }
  0x3d   : > { %p1936_p12 = pneg %p1935_p4  ;;  %p1942_p5 = por %p1941_p3, %p1940_p2 }
  0x3f   : > { %p1943_p10 = pnand %p1942_p5, %p1936_p12 }
  0x41   : > { %1946 = shalt.err (!%p1943_p10)
}
  0x42   : > { %s2022_s10 = smov 2048   ;;  %s2023_s11 = smov 512  }
  0x43   : > { %s2024_s12 = smov 32   ;;  %p3691_p9 = scmp.ne.s32.totalorder %s3687_s23, 0 }
  0x44   : > { %1770 = dma.hbm_to_vmem [thread:$0]  (!%p3690_p8), %s2138_s21, 32768, %s2140_s25, %s2142_s26, %s2022_s10, %s2023_s11, %s2024_s12  }
  0x45   : > { %168 = sbr.rel (%p3691_p9) target bundleno = 1026 (0x402), region = 32 }
  0x4a   : > { %p3692_p13 = scmp.eq.s32.totalorder %s2066_s16, 0 }
  0x4c   : > { %1988 = dma.done.wait (%p3692_p13), [#allocation7], 512   ;;  %p3693_p0 = pmov %p3692_p13 }
  0x4e   : > { %1990 = vsyncadd (%p3693_p0), [#allocation7], 4294966784  ;;  %p3694_p1 = pmov %p3693_p0 }
  0x4f   : > { %p3695_p6 = pmov %p3693_p0 }
  0x50   : > { %1992 = dma.done.wait (%p3694_p1), [#allocation10], 512  }
  0x51   : > { %1994 = vsyncadd (%p3695_p6), [#allocation10], 4294966784  ;;  %s178_s29 = sand.u32 1, %s2066_s16   ;;  %s180_s18 = sand.u32 1, %s2009_s13  }
  0x52   : > { %s1734_s19 = sshll.u32 %s180_s18, 11  ;;  %s179_s23 = scalar_lea.sflag [#allocation7], %s178_s29 }
  0x53   : > { %s2175_s21 = scalar_lea.vmem [#allocation11], %s1734_s19  ;;  %p3696_p8 = scmp.ne.s32.totalorder %s3686_s22, 0 }
  0x55   : > { %1996 = dma.done.wait (%p3696_p8), %s179_s23, 32768  }
  0x56   : > { %1998 = vsyncadd (%p3696_p8), %s179_s23, 4294934528  ;;  %p3697_p7 = scmp.ne.s32.totalorder %s2066_s16, 0 }
  0x58   : > { %204 = sbr.rel (%p3697_p7) target bundleno = 96 (0x60), region = 48 }
  0x5d   : > { %vm205_vm0 = vcmask 64512   ;;  %vm208_vm1 = vcmask 0   ;;  %v2025_v0 = vmov 0.0  }
  0x5e   : > { %206 = vst.msk [vmem:[#allocation2] sm:$0xff] %vm205_vm0, %v2025_v0  ;;  %207 = vst.msk [vmem:[#allocation3] sm:$0xff] %vm205_vm0, %v2025_v0 }
  0x5f   : > { %209 = vst.msk [vmem:[#allocation4] sm:$0x1] %vm208_vm1, %v2025_v0  ;;  %210 = vst.msk [vmem:[#allocation5] sm:$0x1] %vm208_vm1, %v2025_v0 }
  0x60 PF: > { %v272_v1 = vld [vmem:[%s2175_s21 + $0x1e8] sm:$0xff]  ;;  %v271_v3 = vld [vmem:[%s2175_s21 + $0x1e0] sm:$0xff]  ;;  %vm1479_vm2 = vcmask 64512   ;;  %vm1323_vm3 = vcmask 0   ;;  %p1740_p11 = scmp.ne.s32.totalorder %s2066_s16, 3 }
  0x61   : > { %v400_v2 = vld [vmem:[%s2175_s21 + $0x5e8] sm:$0xff]  ;;  %471 = vmatprep.subr.mxu0 %v272_v1  ;;  %v399_v4 = vld [vmem:[%s2175_s21 + $0x5e0] sm:$0xff] }
  0x62   : > { %542 = vmatprep.subr.mxu1 %v400_v2  ;;  %v268_v5 = vld [vmem:[%s2175_s21 + $0x1c8] sm:$0xff]  ;;  %472 = vmatpush1.msra.mxu0 %v271_v3  ;;  %v267_v7 = vld [vmem:[%s2175_s21 + $0x1c0] sm:$0xff] }
  0x63   : > { %v396_v6 = vld [vmem:[%s2175_s21 + $0x5c8] sm:$0xff]  ;;  %543 = vmatpush1.msra.mxu1 %v399_v4  ;;  %v395_v8 = vld [vmem:[%s2175_s21 + $0x5c0] sm:$0xff]  ;;  %473 = vmatprep.subr.mxu0 %v268_v5 }
  0x64   : > { %v264_v9 = vld [vmem:[%s2175_s21 + $0x1a8] sm:$0xff]  ;;  %544 = vmatprep.subr.mxu1 %v396_v6  ;;  %v263_v11 = vld [vmem:[%s2175_s21 + $0x1a0] sm:$0xff]  ;;  %474 = vmatpush1.msra.mxu0 %v267_v7 }
  0x65   : > { %v392_v10 = vld [vmem:[%s2175_s21 + $0x5a8] sm:$0xff]  ;;  %v391_v12 = vld [vmem:[%s2175_s21 + $0x5a0] sm:$0xff]  ;;  %545 = vmatpush1.msra.mxu1 %v395_v8  ;;  %475 = vmatprep.subr.mxu0 %v264_v9 }
  0x66   : > { %v260_v13 = vld [vmem:[%s2175_s21 + $0x188] sm:$0xff]  ;;  %546 = vmatprep.subr.mxu1 %v392_v10  ;;  %v259_v15 = vld [vmem:[%s2175_s21 + $0x180] sm:$0xff]  ;;  %476 = vmatpush1.msra.mxu0 %v263_v11 }
  0x67   : > { %v388_v14 = vld [vmem:[%s2175_s21 + $0x588] sm:$0xff]  ;;  %v387_v16 = vld [vmem:[%s2175_s21 + $0x580] sm:$0xff]  ;;  %547 = vmatpush1.msra.mxu1 %v391_v12  ;;  %477 = vmatprep.subr.mxu0 %v260_v13 }
  0x68   : > { %v256_v17 = vld [vmem:[%s2175_s21 + $0x168] sm:$0xff]  ;;  %548 = vmatprep.subr.mxu1 %v388_v14  ;;  %v2202_v19 = vld [vmem:[%s2175_s21 + $0x160] sm:$0xff]  ;;  %478 = vmatpush1.msra.mxu0 %v259_v15 }
  0x69   : > { %v384_v18 = vld [vmem:[%s2175_s21 + $0x568] sm:$0xff]  ;;  %v2205_v20 = vld [vmem:[%s2175_s21 + $0x560] sm:$0xff]  ;;  %549 = vmatpush1.msra.mxu1 %v387_v16  ;;  %479 = vmatprep.subr.mxu0 %v256_v17 }
  0x6a   : > { %v2208_v21 = vld [vmem:[%s2175_s21 + $0x148] sm:$0xff]  ;;  %550 = vmatprep.subr.mxu1 %v384_v18  ;;  %v2214_v23 = vld [vmem:[%s2175_s21 + $0x140] sm:$0xff]  ;;  %480 = vmatpush1.msra.mxu0 %v2202_v19 }
  0x6b   : > { %v2211_v22 = vld [vmem:[%s2175_s21 + $0x548] sm:$0xff]  ;;  %v2217_v24 = vld [vmem:[%s2175_s21 + $0x540] sm:$0xff]  ;;  %551 = vmatpush1.msra.mxu1 %v2205_v20  ;;  %481 = vmatprep.subr.mxu0 %v2208_v21 }
  0x6c   : > { %v2222_v25 = vld [vmem:[%s2175_s21 + $0x128] sm:$0xff]  ;;  %552 = vmatprep.subr.mxu1 %v2211_v22  ;;  %v2230_v27 = vld [vmem:[%s2175_s21 + $0x120] sm:$0xff]  ;;  %482 = vmatpush1.msra.mxu0 %v2214_v23 }
  0x6d   : > { %v2225_v26 = vld [vmem:[%s2175_s21 + $0x528] sm:$0xff]  ;;  %v2233_v28 = vld [vmem:[%s2175_s21 + $0x520] sm:$0xff]  ;;  %553 = vmatpush1.msra.mxu1 %v2217_v24  ;;  %483 = vmatprep.subr.mxu0 %v2222_v25 }
  0x6e   : > { %v2238_v29 = vld [vmem:[%s2175_s21 + $0x108] sm:$0xff]  ;;  %554 = vmatprep.subr.mxu1 %v2225_v26  ;;  %v2246_v31 = vld [vmem:[%s2175_s21 + $0x100] sm:$0xff]  ;;  %484 = vmatpush1.msra.mxu0 %v2230_v27 }
  0x6f   : > { %v2241_v30 = vld [vmem:[%s2175_s21 + $0x508] sm:$0xff]  ;;  %v2249_v32 = vld [vmem:[%s2175_s21 + $0x500] sm:$0xff]  ;;  %555 = vmatpush1.msra.mxu1 %v2233_v28  ;;  %485 = vmatprep.subr.mxu0 %v2238_v29 }
  0x70   : > { %v2254_v33 = vld [vmem:[%s2175_s21 + $0xe8] sm:$0xff]  ;;  %556 = vmatprep.subr.mxu1 %v2241_v30  ;;  %v2262_v35 = vld [vmem:[%s2175_s21 + $0xe0] sm:$0xff]  ;;  %486 = vmatpush1.msra.mxu0 %v2246_v31 }
  0x71   : > { %v2257_v34 = vld [vmem:[%s2175_s21 + $0x4e8] sm:$0xff]  ;;  %v2265_v36 = vld [vmem:[%s2175_s21 + $0x4e0] sm:$0xff]  ;;  %557 = vmatpush1.msra.mxu1 %v2249_v32  ;;  %487 = vmatprep.subr.mxu0 %v2254_v33 }
  0x72   : > { %v2270_v37 = vld [vmem:[%s2175_s21 + $0xc8] sm:$0xff]  ;;  %558 = vmatprep.subr.mxu1 %v2257_v34  ;;  %v2278_v39 = vld [vmem:[%s2175_s21 + $0xc0] sm:$0xff]  ;;  %488 = vmatpush1.msra.mxu0 %v2262_v35 }
  0x73   : > { %v2273_v38 = vld [vmem:[%s2175_s21 + $0x4c8] sm:$0xff]  ;;  %v2281_v40 = vld [vmem:[%s2175_s21 + $0x4c0] sm:$0xff]  ;;  %559 = vmatpush1.msra.mxu1 %v2265_v36  ;;  %489 = vmatprep.subr.mxu0 %v2270_v37 }
  0x74   : > { %v2286_v41 = vld [vmem:[%s2175_s21 + $0xa8] sm:$0xff]  ;;  %560 = vmatprep.subr.mxu1 %v2273_v38  ;;  %v2294_v43 = vld [vmem:[%s2175_s21 + $0xa0] sm:$0xff]  ;;  %490 = vmatpush1.msra.mxu0 %v2278_v39 }
  0x75   : > { %v2289_v42 = vld [vmem:[%s2175_s21 + $0x4a8] sm:$0xff]  ;;  %v2297_v44 = vld [vmem:[%s2175_s21 + $0x4a0] sm:$0xff]  ;;  %561 = vmatpush1.msra.mxu1 %v2281_v40  ;;  %491 = vmatprep.subr.mxu0 %v2286_v41 }
  0x76   : > { %v2302_v45 = vld [vmem:[%s2175_s21 + $0x88] sm:$0xff]  ;;  %562 = vmatprep.subr.mxu1 %v2289_v42  ;;  %v2310_v47 = vld [vmem:[%s2175_s21 + $0x80] sm:$0xff]  ;;  %492 = vmatpush1.msra.mxu0 %v2294_v43 }
  0x77   : > { %v2305_v46 = vld [vmem:[%s2175_s21 + $0x488] sm:$0xff]  ;;  %v2313_v48 = vld [vmem:[%s2175_s21 + $0x480] sm:$0xff]  ;;  %563 = vmatpush1.msra.mxu1 %v2297_v44  ;;  %493 = vmatprep.subr.mxu0 %v2302_v45 }
  0x78   : > { %v2318_v49 = vld [vmem:[%s2175_s21 + $0x68] sm:$0xff]  ;;  %564 = vmatprep.subr.mxu1 %v2305_v46  ;;  %v2326_v51 = vld [vmem:[%s2175_s21 + $0x60] sm:$0xff]  ;;  %494 = vmatpush1.msra.mxu0 %v2310_v47 }
  0x79   : > { %v2321_v50 = vld [vmem:[%s2175_s21 + $0x468] sm:$0xff]  ;;  %v2329_v52 = vld [vmem:[%s2175_s21 + $0x460] sm:$0xff]  ;;  %565 = vmatpush1.msra.mxu1 %v2313_v48  ;;  %495 = vmatprep.subr.mxu0 %v2318_v49 }
  0x7a   : > { %v2334_v53 = vld [vmem:[%s2175_s21 + $0x48] sm:$0xff]  ;;  %566 = vmatprep.subr.mxu1 %v2321_v50  ;;  %v2342_v55 = vld [vmem:[%s2175_s21 + $0x40] sm:$0xff]  ;;  %496 = vmatpush1.msra.mxu0 %v2326_v51 }
  0x7b   : > { %v2337_v54 = vld [vmem:[%s2175_s21 + $0x448] sm:$0xff]  ;;  %v2345_v56 = vld [vmem:[%s2175_s21 + $0x440] sm:$0xff]  ;;  %567 = vmatpush1.msra.mxu1 %v2329_v52  ;;  %497 = vmatprep.subr.mxu0 %v2334_v53 }
  0x7c   : > { %v2350_v57 = vld [vmem:[%s2175_s21 + $0x28] sm:$0xff]  ;;  %568 = vmatprep.subr.mxu1 %v2337_v54  ;;  %v2358_v59 = vld [vmem:[%s2175_s21 + $0x20] sm:$0xff]  ;;  %498 = vmatpush1.msra.mxu0 %v2342_v55 }
  0x7d   : > { %v2353_v58 = vld [vmem:[%s2175_s21 + $0x428] sm:$0xff]  ;;  %v2361_v60 = vld [vmem:[%s2175_s21 + $0x420] sm:$0xff]  ;;  %569 = vmatpush1.msra.mxu1 %v2345_v56  ;;  %499 = vmatprep.subr.mxu0 %v2350_v57 }
  0x7e   : > { %v2366_v61 = vld [vmem:[%s2175_s21 + $0x8] sm:$0xff]  ;;  %570 = vmatprep.subr.mxu1 %v2353_v58  ;;  %v2374_v63 = vld [vmem:[%s2175_s21] sm:$0xff]  ;;  %500 = vmatpush1.msra.mxu0 %v2358_v59 }
  0x7f   : > { %v2369_v62 = vld [vmem:[%s2175_s21 + $0x408] sm:$0xff]  ;;  %v2377_v0 = vld [vmem:[%s2175_s21 + $0x400] sm:$0xff]  ;;  %571 = vmatpush1.msra.mxu1 %v2361_v60  ;;  %501 = vmatprep.subr.mxu0 %v2366_v61 }
  0x80   : > { %v2382_v1 = vld [vmem:[%s2175_s21 + $0x3e8] sm:$0xff]  ;;  %572 = vmatprep.subr.mxu1 %v2369_v62  ;;  %v2390_v3 = vld [vmem:[%s2175_s21 + $0x3e0] sm:$0xff]  ;;  %502 = vmatpush1.msra.mxu0 %v2374_v63 }
  0x81   : > { %v2385_v2 = vld [vmem:[%s2175_s21 + $0x7e8] sm:$0xff]  ;;  %v2393_v4 = vld [vmem:[%s2175_s21 + $0x7e0] sm:$0xff]  ;;  %573 = vmatpush1.msra.mxu1 %v2377_v0  ;;  %503 = vmatprep.subr.mxu0 %v2382_v1 }
  0x82   : > { %v2398_v5 = vld [vmem:[%s2175_s21 + $0x3c8] sm:$0xff]  ;;  %574 = vmatprep.subr.mxu1 %v2385_v2  ;;  %v2406_v7 = vld [vmem:[%s2175_s21 + $0x3c0] sm:$0xff]  ;;  %504 = vmatpush2.msra.mxu0 %v2390_v3 }
  0x83   : > { %3698 = vst [vmem:[#allocation17_spill] sm:$0xff] %v2398_v5  ;;  %v2401_v6 = vld [vmem:[%s2175_s21 + $0x7c8] sm:$0xff]  ;;  %3700 = vst [vmem:[#allocation19_spill] sm:$0xff] %v2406_v7  ;;  %v2409_v8 = vld [vmem:[%s2175_s21 + $0x7c0] sm:$0xff]  ;;  %575 = vmatpush2.msra.mxu1 %v2393_v4  ;;  %505 = vmatprep.subr.mxu0 %v2398_v5 }
  0x84   : > { %3699 = vst [vmem:[#allocation18_spill] sm:$0xff] %v2401_v6  ;;  %3701 = vst [vmem:[#allocation20_spill] sm:$0xff] %v2409_v8  ;;  %v2414_v9 = vld [vmem:[%s2175_s21 + $0x3a8] sm:$0xff]  ;;  %576 = vmatprep.subr.mxu1 %v2401_v6  ;;  %v2422_v11 = vld [vmem:[%s2175_s21 + $0x3a0] sm:$0xff]  ;;  %506 = vmatpush2.msra.mxu0 %v2406_v7 }
  0x85   : > { %3702 = vst [vmem:[#allocation21_spill] sm:$0xff] %v2414_v9  ;;  %v2417_v10 = vld [vmem:[%s2175_s21 + $0x7a8] sm:$0xff]  ;;  %3704 = vst [vmem:[#allocation23_spill] sm:$0xff] %v2422_v11  ;;  %v2425_v12 = vld [vmem:[%s2175_s21 + $0x7a0] sm:$0xff]  ;;  %577 = vmatpush2.msra.mxu1 %v2409_v8  ;;  %507 = vmatprep.subr.mxu0 %v2414_v9 }
  0x86   : > { %3703 = vst [vmem:[#allocation22_spill] sm:$0xff] %v2417_v10  ;;  %3705 = vst [vmem:[#allocation24_spill] sm:$0xff] %v2425_v12  ;;  %v2430_v13 = vld [vmem:[%s2175_s21 + $0x388] sm:$0xff]  ;;  %578 = vmatprep.subr.mxu1 %v2417_v10  ;;  %v2438_v15 = vld [vmem:[%s2175_s21 + $0x380] sm:$0xff]  ;;  %508 = vmatpush2.msra.mxu0 %v2422_v11 }
  0x87   : > { %3706 = vst [vmem:[#allocation25_spill] sm:$0xff] %v2430_v13  ;;  %v2433_v14 = vld [vmem:[%s2175_s21 + $0x788] sm:$0xff]  ;;  %3708 = vst [vmem:[#allocation27_spill] sm:$0xff] %v2438_v15  ;;  %v2441_v16 = vld [vmem:[%s2175_s21 + $0x780] sm:$0xff]  ;;  %579 = vmatpush2.msra.mxu1 %v2425_v12  ;;  %509 = vmatprep.subr.mxu0 %v2430_v13 }
  0x88   : > { %3707 = vst [vmem:[#allocation26_spill] sm:$0xff] %v2433_v14  ;;  %3709 = vst [vmem:[#allocation28_spill] sm:$0xff] %v2441_v16  ;;  %v2446_v17 = vld [vmem:[%s2175_s21 + $0x368] sm:$0xff]  ;;  %580 = vmatprep.subr.mxu1 %v2433_v14  ;;  %v2454_v10 = vld [vmem:[%s2175_s21 + $0x360] sm:$0xff]  ;;  %510 = vmatpush2.msra.mxu0 %v2438_v15 }
  0x89   : > { %3710 = vst [vmem:[#allocation29_spill] sm:$0xff] %v2446_v17  ;;  %v2449_v18 = vld [vmem:[%s2175_s21 + $0x768] sm:$0xff]  ;;  %3712 = vst [vmem:[#allocation31_spill] sm:$0xff] %v2454_v10  ;;  %v2457_v9 = vld [vmem:[%s2175_s21 + $0x760] sm:$0xff]  ;;  %581 = vmatpush2.msra.mxu1 %v2441_v16  ;;  %511 = vmatprep.subr.mxu0 %v2446_v17 }
  0x8a   : > { %3711 = vst [vmem:[#allocation30_spill] sm:$0xff] %v2449_v18  ;;  %3713 = vst [vmem:[#allocation32_spill] sm:$0xff] %v2457_v9  ;;  %v2462_v12 = vld [vmem:[%s2175_s21 + $0x348] sm:$0xff]  ;;  %582 = vmatprep.subr.mxu1 %v2449_v18  ;;  %v2470_v14 = vld [vmem:[%s2175_s21 + $0x340] sm:$0xff]  ;;  %512 = vmatpush2.msra.mxu0 %v2454_v10 }
  0x8b   : > { %3714 = vst [vmem:[#allocation33_spill] sm:$0xff] %v2462_v12  ;;  %v2465_v11 = vld [vmem:[%s2175_s21 + $0x748] sm:$0xff]  ;;  %3716 = vst [vmem:[#allocation35_spill] sm:$0xff] %v2470_v14  ;;  %v2473_v13 = vld [vmem:[%s2175_s21 + $0x740] sm:$0xff]  ;;  %583 = vmatpush2.msra.mxu1 %v2457_v9  ;;  %513 = vmatprep.subr.mxu0 %v2462_v12 }
  0x8c   : > { %3715 = vst [vmem:[#allocation34_spill] sm:$0xff] %v2465_v11  ;;  %3717 = vst [vmem:[#allocation36_spill] sm:$0xff] %v2473_v13  ;;  %v2478_v16 = vld [vmem:[%s2175_s21 + $0x328] sm:$0xff]  ;;  %584 = vmatprep.subr.mxu1 %v2465_v11  ;;  %v2486_v18 = vld [vmem:[%s2175_s21 + $0x320] sm:$0xff]  ;;  %514 = vmatpush2.msra.mxu0 %v2470_v14 }
  0x8d   : > { %3718 = vst [vmem:[#allocation37_spill] sm:$0xff] %v2478_v16  ;;  %v2481_v15 = vld [vmem:[%s2175_s21 + $0x728] sm:$0xff]  ;;  %3720 = vst [vmem:[#allocation39_spill] sm:$0xff] %v2486_v18  ;;  %v2489_v17 = vld [vmem:[%s2175_s21 + $0x720] sm:$0xff]  ;;  %585 = vmatpush2.msra.mxu1 %v2473_v13  ;;  %515 = vmatprep.subr.mxu0 %v2478_v16 }
  0x8e   : > { %3719 = vst [vmem:[#allocation38_spill] sm:$0xff] %v2481_v15  ;;  %3721 = vst [vmem:[#allocation40_spill] sm:$0xff] %v2489_v17  ;;  %v2494_v9 = vld [vmem:[%s2175_s21 + $0x308] sm:$0xff]  ;;  %586 = vmatprep.subr.mxu1 %v2481_v15  ;;  %v2502_v11 = vld [vmem:[%s2175_s21 + $0x300] sm:$0xff]  ;;  %516 = vmatpush2.msra.mxu0 %v2486_v18 }
  0x8f   : > { %3722 = vst [vmem:[#allocation41_spill] sm:$0xff] %v2494_v9  ;;  %v2497_v10 = vld [vmem:[%s2175_s21 + $0x708] sm:$0xff]  ;;  %3724 = vst [vmem:[#allocation43_spill] sm:$0xff] %v2502_v11  ;;  %v2505_v12 = vld [vmem:[%s2175_s21 + $0x700] sm:$0xff]  ;;  %587 = vmatpush2.msra.mxu1 %v2489_v17  ;;  %517 = vmatprep.subr.mxu0 %v2494_v9 }
  0x90   : > { %3723 = vst [vmem:[#allocation42_spill] sm:$0xff] %v2497_v10  ;;  %3725 = vst [vmem:[#allocation44_spill] sm:$0xff] %v2505_v12  ;;  %v2510_v13 = vld [vmem:[%s2175_s21 + $0x2e8] sm:$0xff]  ;;  %588 = vmatprep.subr.mxu1 %v2497_v10  ;;  %v2518_v15 = vld [vmem:[%s2175_s21 + $0x2e0] sm:$0xff]  ;;  %518 = vmatpush2.msra.mxu0 %v2502_v11 }
  0x91   : > { %3726 = vst [vmem:[#allocation45_spill] sm:$0xff] %v2510_v13  ;;  %v2513_v14 = vld [vmem:[%s2175_s21 + $0x6e8] sm:$0xff]  ;;  %3728 = vst [vmem:[#allocation47_spill] sm:$0xff] %v2518_v15  ;;  %v2521_v16 = vld [vmem:[%s2175_s21 + $0x6e0] sm:$0xff]  ;;  %589 = vmatpush2.msra.mxu1 %v2505_v12  ;;  %519 = vmatprep.subr.mxu0 %v2510_v13 }
  0x92   : > { %3727 = vst [vmem:[#allocation46_spill] sm:$0xff] %v2513_v14  ;;  %3729 = vst [vmem:[#allocation48_spill] sm:$0xff] %v2521_v16  ;;  %v2526_v17 = vld [vmem:[%s2175_s21 + $0x2c8] sm:$0xff]  ;;  %590 = vmatprep.subr.mxu1 %v2513_v14  ;;  %v2534_v10 = vld [vmem:[%s2175_s21 + $0x2c0] sm:$0xff]  ;;  %520 = vmatpush2.msra.mxu0 %v2518_v15 }
  0x93   : > { %3730 = vst [vmem:[#allocation49_spill] sm:$0xff] %v2526_v17  ;;  %v2529_v18 = vld [vmem:[%s2175_s21 + $0x6c8] sm:$0xff]  ;;  %3732 = vst [vmem:[#allocation51_spill] sm:$0xff] %v2534_v10  ;;  %v2537_v9 = vld [vmem:[%s2175_s21 + $0x6c0] sm:$0xff]  ;;  %591 = vmatpush2.msra.mxu1 %v2521_v16  ;;  %521 = vmatprep.subr.mxu0 %v2526_v17 }
  0x94   : > { %3731 = vst [vmem:[#allocation50_spill] sm:$0xff] %v2529_v18  ;;  %3733 = vst [vmem:[#allocation52_spill] sm:$0xff] %v2537_v9  ;;  %v2542_v12 = vld [vmem:[%s2175_s21 + $0x2a8] sm:$0xff]  ;;  %592 = vmatprep.subr.mxu1 %v2529_v18  ;;  %v2550_v14 = vld [vmem:[%s2175_s21 + $0x2a0] sm:$0xff]  ;;  %522 = vmatpush2.msra.mxu0 %v2534_v10 }
  0x95   : > { %3734 = vst [vmem:[#allocation53_spill] sm:$0xff] %v2542_v12  ;;  %v2545_v11 = vld [vmem:[%s2175_s21 + $0x6a8] sm:$0xff]  ;;  %3736 = vst [vmem:[#allocation55_spill] sm:$0xff] %v2550_v14  ;;  %v2553_v13 = vld [vmem:[%s2175_s21 + $0x6a0] sm:$0xff]  ;;  %593 = vmatpush2.msra.mxu1 %v2537_v9  ;;  %523 = vmatprep.subr.mxu0 %v2542_v12 }
  0x96   : > { %3735 = vst [vmem:[#allocation54_spill] sm:$0xff] %v2545_v11  ;;  %3737 = vst [vmem:[#allocation56_spill] sm:$0xff] %v2553_v13  ;;  %v2558_v16 = vld [vmem:[%s2175_s21 + $0x288] sm:$0xff]  ;;  %594 = vmatprep.subr.mxu1 %v2545_v11  ;;  %v2566_v18 = vld [vmem:[%s2175_s21 + $0x280] sm:$0xff]  ;;  %524 = vmatpush2.msra.mxu0 %v2550_v14 }
  0x97   : > { %3738 = vst [vmem:[#allocation57_spill] sm:$0xff] %v2558_v16  ;;  %v2561_v15 = vld [vmem:[%s2175_s21 + $0x688] sm:$0xff]  ;;  %3740 = vst [vmem:[#allocation59_spill] sm:$0xff] %v2566_v18  ;;  %v2569_v17 = vld [vmem:[%s2175_s21 + $0x680] sm:$0xff]  ;;  %595 = vmatpush2.msra.mxu1 %v2553_v13  ;;  %525 = vmatprep.subr.mxu0 %v2558_v16 }
  0x98   : > { %3739 = vst [vmem:[#allocation58_spill] sm:$0xff] %v2561_v15  ;;  %3741 = vst [vmem:[#allocation60_spill] sm:$0xff] %v2569_v17  ;;  %v2574_v9 = vld [vmem:[%s2175_s21 + $0x268] sm:$0xff]  ;;  %596 = vmatprep.subr.mxu1 %v2561_v15  ;;  %v2582_v11 = vld [vmem:[%s2175_s21 + $0x260] sm:$0xff]  ;;  %526 = vmatpush2.msra.mxu0 %v2566_v18 }
  0x99   : > { %3742 = vst [vmem:[#allocation61_spill] sm:$0xff] %v2574_v9  ;;  %v2577_v10 = vld [vmem:[%s2175_s21 + $0x668] sm:$0xff]  ;;  %3744 = vst [vmem:[#allocation63_spill] sm:$0xff] %v2582_v11  ;;  %v2585_v12 = vld [vmem:[%s2175_s21 + $0x660] sm:$0xff]  ;;  %597 = vmatpush2.msra.mxu1 %v2569_v17  ;;  %527 = vmatprep.subr.mxu0 %v2574_v9 }
  0x9a   : > { %3743 = vst [vmem:[#allocation62_spill] sm:$0xff] %v2577_v10  ;;  %3745 = vst [vmem:[#allocation64_spill] sm:$0xff] %v2585_v12  ;;  %v2590_v13 = vld [vmem:[%s2175_s21 + $0x248] sm:$0xff]  ;;  %598 = vmatprep.subr.mxu1 %v2577_v10  ;;  %v2598_v15 = vld [vmem:[%s2175_s21 + $0x240] sm:$0xff]  ;;  %528 = vmatpush2.msra.mxu0 %v2582_v11 }
  0x9b   : > { %3746 = vst [vmem:[#allocation65_spill] sm:$0xff] %v2590_v13  ;;  %v2593_v14 = vld [vmem:[%s2175_s21 + $0x648] sm:$0xff]  ;;  %3748 = vst [vmem:[#allocation67_spill] sm:$0xff] %v2598_v15  ;;  %v2601_v16 = vld [vmem:[%s2175_s21 + $0x640] sm:$0xff]  ;;  %599 = vmatpush2.msra.mxu1 %v2585_v12  ;;  %529 = vmatprep.subr.mxu0 %v2590_v13 }
  0x9c   : > { %3747 = vst [vmem:[#allocation66_spill] sm:$0xff] %v2593_v14  ;;  %3749 = vst [vmem:[#allocation68_spill] sm:$0xff] %v2601_v16  ;;  %v2606_v17 = vld [vmem:[%s2175_s21 + $0x228] sm:$0xff]  ;;  %600 = vmatprep.subr.mxu1 %v2593_v14  ;;  %v2614_v9 = vld [vmem:[%s2175_s21 + $0x220] sm:$0xff]  ;;  %530 = vmatpush2.msra.mxu0 %v2598_v15 }
  0x9d   : > { %3750 = vst [vmem:[#allocation69_spill] sm:$0xff] %v2606_v17  ;;  %v2609_v18 = vld [vmem:[%s2175_s21 + $0x628] sm:$0xff]  ;;  %3752 = vst [vmem:[#allocation71_spill] sm:$0xff] %v2614_v9  ;;  %v2617_v10 = vld [vmem:[%s2175_s21 + $0x620] sm:$0xff]  ;;  %601 = vmatpush2.msra.mxu1 %v2601_v16  ;;  %531 = vmatprep.subr.mxu0 %v2606_v17 }
  0x9e   : > { %3751 = vst [vmem:[#allocation70_spill] sm:$0xff] %v2609_v18  ;;  %3753 = vst [vmem:[#allocation72_spill] sm:$0xff] %v2617_v10  ;;  %v2622_v11 = vld [vmem:[%s2175_s21 + $0x208] sm:$0xff]  ;;  %602 = vmatprep.subr.mxu1 %v2609_v18  ;;  %v2630_v13 = vld [vmem:[%s2175_s21 + $0x200] sm:$0xff]  ;;  %532 = vmatpush2.msra.mxu0 %v2614_v9 }
  0x9f   : > { %3754 = vst [vmem:[#allocation73_spill] sm:$0xff] %v2622_v11  ;;  %v2625_v12 = vld [vmem:[%s2175_s21 + $0x608] sm:$0xff]  ;;  %3756 = vst [vmem:[#allocation75_spill] sm:$0xff] %v2630_v13  ;;  %603 = vmatpush2.msra.mxu1 %v2617_v10  ;;  %v2637_v16 = vld [vmem:[%s2175_s21 + $0x600] sm:$0xff]  ;;  %533 = vmatprep.subr.mxu0 %v2622_v11 }
  0xa0   : > { %3755 = vst [vmem:[#allocation74_spill] sm:$0xff] %v2625_v12  ;;  %v2632_v14 = vld [vmem:[#allocation6 + $0x8] sm:$0xff]  ;;  %3757 = vst [vmem:[#allocation76_spill] sm:$0xff] %v2637_v16  ;;  %v2639_v15 = vld [vmem:[#allocation6 + $0x18] sm:$0xff]  ;;  %604 = vmatprep.subr.mxu1 %v2625_v12  ;;  %534 = vmatpush2.msra.mxu0 %v2630_v13 }
  0xa1   : > { %v2643_v18 = vld [vmem:[#allocation6] sm:$0xff]  ;;  %v2645_v17 = vld [vmem:[#allocation6 + $0x10] sm:$0xff]  ;;  %535 = vmatprep.mubr.f32.mxu0 %v2632_v14  ;;  %v2650_v10 = vld [vmem:[%s2175_s21 + $0x1f8] sm:$0xff]  ;;  %605 = vmatpush2.msra.mxu1 %v2637_v16 }
  0xa2   : > { %3758 = vst [vmem:[#allocation77_spill] sm:$0xff] %v2650_v10  ;;  %v2653_v9 = vld [vmem:[%s2175_s21 + $0x5f8] sm:$0xff]  ;;  %606 = vmatprep.mubr.f32.mxu1 %v2639_v15  ;;  %v2658_v12 = vld [vmem:[%s2175_s21 + $0x1f0] sm:$0xff]  ;;  %536 = vmatmul.mubr.f32.vlgmr.msra.gmra.mxu0 %v2643_v18 }
  0xa3   : > { %3759 = vst [vmem:[#allocation78_spill] sm:$0xff] %v2653_v9  ;;  %3760 = vst [vmem:[#allocation79_spill] sm:$0xff] %v2658_v12  ;;  %v2661_v11 = vld [vmem:[%s2175_s21 + $0x5f0] sm:$0xff]  ;;  %607 = vmatmul.mubr.f32.vlgmr.msra.gmra.mxu1 %v2645_v17  ;;  %v2666_v13 = vld [vmem:[%s2175_s21 + $0x1d8] sm:$0xff]  ;;  %613 = vmatprep.subr.mxu0 %v2650_v10 }
  0xa4   : > { %3761 = vst [vmem:[#allocation80_spill] sm:$0xff] %v2661_v11  ;;  %3762 = vst [vmem:[#allocation81_spill] sm:$0xff] %v2666_v13  ;;  %v2669_v8 = vld [vmem:[%s2175_s21 + $0x5d8] sm:$0xff]  ;;  %684 = vmatprep.subr.mxu1 %v2653_v9  ;;  %v2674_v16 = vld [vmem:[%s2175_s21 + $0x1d0] sm:$0xff]  ;;  %614 = vmatpush1.msra.mxu0 %v2658_v12 }
  0xa5   : > { %3763 = vst [vmem:[#allocation82_spill] sm:$0xff] %v2669_v8  ;;  %3764 = vst [vmem:[#allocation83_spill] sm:$0xff] %v2674_v16  ;;  %v2677_v7 = vld [vmem:[%s2175_s21 + $0x5d0] sm:$0xff]  ;;  %685 = vmatpush1.msra.mxu1 %v2661_v11  ;;  %v2682_v6 = vld [vmem:[%s2175_s21 + $0x1b8] sm:$0xff]  ;;  %615 = vmatprep.subr.mxu0 %v2666_v13 }
  0xa6   : > { %3765 = vst [vmem:[#allocation84_spill] sm:$0xff] %v2677_v7  ;;  %3766 = vst [vmem:[#allocation85_spill] sm:$0xff] %v2682_v6  ;;  %v2685_v5 = vld [vmem:[%s2175_s21 + $0x5b8] sm:$0xff]  ;;  %686 = vmatprep.subr.mxu1 %v2669_v8  ;;  %v2690_v9 = vld [vmem:[%s2175_s21 + $0x1b0] sm:$0xff]  ;;  %616 = vmatpush1.msra.mxu0 %v2674_v16 }
  0xa7   : > { %3767 = vst [vmem:[#allocation86_spill] sm:$0xff] %v2685_v5  ;;  %3768 = vst [vmem:[#allocation87_spill] sm:$0xff] %v2690_v9  ;;  %v2693_v10 = vld [vmem:[%s2175_s21 + $0x5b0] sm:$0xff]  ;;  %687 = vmatpush1.msra.mxu1 %v2677_v7  ;;  %v2698_v11 = vld [vmem:[%s2175_s21 + $0x198] sm:$0xff]  ;;  %617 = vmatprep.subr.mxu0 %v2682_v6 }
  0xa8   : > { %3769 = vst [vmem:[#allocation88_spill] sm:$0xff] %v2693_v10  ;;  %3770 = vst [vmem:[#allocation89_spill] sm:$0xff] %v2698_v11  ;;  %v2701_v12 = vld [vmem:[%s2175_s21 + $0x598] sm:$0xff]  ;;  %688 = vmatprep.subr.mxu1 %v2685_v5  ;;  %v2706_v8 = vld [vmem:[%s2175_s21 + $0x190] sm:$0xff]  ;;  %618 = vmatpush1.msra.mxu0 %v2690_v9 }
  0xa9   : > { %3771 = vst [vmem:[#allocation90_spill] sm:$0xff] %v2701_v12  ;;  %3772 = vst [vmem:[#allocation91_spill] sm:$0xff] %v2706_v8  ;;  %v2709_v13 = vld [vmem:[%s2175_s21 + $0x590] sm:$0xff]  ;;  %689 = vmatpush1.msra.mxu1 %v2693_v10  ;;  %v2714_v7 = vld [vmem:[%s2175_s21 + $0x178] sm:$0xff]  ;;  %619 = vmatprep.subr.mxu0 %v2698_v11 }
  0xaa   : > { %3773 = vst [vmem:[#allocation92_spill] sm:$0xff] %v2709_v13  ;;  %3774 = vst [vmem:[#allocation93_spill] sm:$0xff] %v2714_v7  ;;  %v2717_v16 = vld [vmem:[%s2175_s21 + $0x578] sm:$0xff]  ;;  %690 = vmatprep.subr.mxu1 %v2701_v12  ;;  %v2722_v5 = vld [vmem:[%s2175_s21 + $0x170] sm:$0xff]  ;;  %620 = vmatpush1.msra.mxu0 %v2706_v8 }
  0xab   : > { %3775 = vst [vmem:[#allocation94_spill] sm:$0xff] %v2717_v16  ;;  %3776 = vst [vmem:[#allocation95_spill] sm:$0xff] %v2722_v5  ;;  %v2725_v6 = vld [vmem:[%s2175_s21 + $0x570] sm:$0xff]  ;;  %691 = vmatpush1.msra.mxu1 %v2709_v13  ;;  %v2730_v10 = vld [vmem:[%s2175_s21 + $0x158] sm:$0xff]  ;;  %621 = vmatprep.subr.mxu0 %v2714_v7 }
  0xac   : > { %3777 = vst [vmem:[#allocation96_spill] sm:$0xff] %v2725_v6  ;;  %3778 = vst [vmem:[#allocation97_spill] sm:$0xff] %v2730_v10  ;;  %v2733_v9 = vld [vmem:[%s2175_s21 + $0x558] sm:$0xff]  ;;  %692 = vmatprep.subr.mxu1 %v2717_v16  ;;  %v2738_v12 = vld [vmem:[%s2175_s21 + $0x150] sm:$0xff]  ;;  %622 = vmatpush1.msra.mxu0 %v2722_v5 }
  0xad   : > { %3779 = vst [vmem:[#allocation98_spill] sm:$0xff] %v2733_v9  ;;  %3780 = vst [vmem:[#allocation99_spill] sm:$0xff] %v2738_v12  ;;  %v2741_v11 = vld [vmem:[%s2175_s21 + $0x550] sm:$0xff]  ;;  %693 = vmatpush1.msra.mxu1 %v2725_v6  ;;  %v2746_v13 = vld [vmem:[%s2175_s21 + $0x138] sm:$0xff]  ;;  %623 = vmatprep.subr.mxu0 %v2730_v10 }
  0xae   : > { %3781 = vst [vmem:[#allocation100_spill] sm:$0xff] %v2741_v11  ;;  %3782 = vst [vmem:[#allocation101_spill] sm:$0xff] %v2746_v13  ;;  %v2749_v8 = vld [vmem:[%s2175_s21 + $0x538] sm:$0xff]  ;;  %694 = vmatprep.subr.mxu1 %v2733_v9  ;;  %v2754_v16 = vld [vmem:[%s2175_s21 + $0x130] sm:$0xff]  ;;  %624 = vmatpush1.msra.mxu0 %v2738_v12 }
  0xaf   : > { %3783 = vst [vmem:[#allocation102_spill] sm:$0xff] %v2749_v8  ;;  %3784 = vst [vmem:[#allocation103_spill] sm:$0xff] %v2754_v16  ;;  %v2757_v7 = vld [vmem:[%s2175_s21 + $0x530] sm:$0xff]  ;;  %695 = vmatpush1.msra.mxu1 %v2741_v11  ;;  %v2762_v6 = vld [vmem:[%s2175_s21 + $0x118] sm:$0xff]  ;;  %625 = vmatprep.subr.mxu0 %v2746_v13 }
  0xb0   : > { %3785 = vst [vmem:[#allocation104_spill] sm:$0xff] %v2757_v7  ;;  %3786 = vst [vmem:[#allocation105_spill] sm:$0xff] %v2762_v6  ;;  %v2765_v5 = vld [vmem:[%s2175_s21 + $0x518] sm:$0xff]  ;;  %696 = vmatprep.subr.mxu1 %v2749_v8  ;;  %v2770_v9 = vld [vmem:[%s2175_s21 + $0x110] sm:$0xff]  ;;  %626 = vmatpush1.msra.mxu0 %v2754_v16 }
  0xb1   : > { %3787 = vst [vmem:[#allocation106_spill] sm:$0xff] %v2765_v5  ;;  %3788 = vst [vmem:[#allocation107_spill] sm:$0xff] %v2770_v9  ;;  %v2773_v10 = vld [vmem:[%s2175_s21 + $0x510] sm:$0xff]  ;;  %697 = vmatpush1.msra.mxu1 %v2757_v7  ;;  %v2778_v11 = vld [vmem:[%s2175_s21 + $0xf8] sm:$0xff]  ;;  %627 = vmatprep.subr.mxu0 %v2762_v6 }
  0xb2   : > { %3789 = vst [vmem:[#allocation108_spill] sm:$0xff] %v2773_v10  ;;  %3790 = vst [vmem:[#allocation109_spill] sm:$0xff] %v2778_v11  ;;  %v2781_v12 = vld [vmem:[%s2175_s21 + $0x4f8] sm:$0xff]  ;;  %698 = vmatprep.subr.mxu1 %v2765_v5  ;;  %v2786_v8 = vld [vmem:[%s2175_s21 + $0xf0] sm:$0xff]  ;;  %628 = vmatpush1.msra.mxu0 %v2770_v9 }
  0xb3   : > { %3791 = vst [vmem:[#allocation110_spill] sm:$0xff] %v2781_v12  ;;  %3792 = vst [vmem:[#allocation111_spill] sm:$0xff] %v2786_v8  ;;  %v2789_v13 = vld [vmem:[%s2175_s21 + $0x4f0] sm:$0xff]  ;;  %699 = vmatpush1.msra.mxu1 %v2773_v10  ;;  %v2794_v7 = vld [vmem:[%s2175_s21 + $0xd8] sm:$0xff]  ;;  %629 = vmatprep.subr.mxu0 %v2778_v11 }
  0xb4   : > { %3793 = vst [vmem:[#allocation112_spill] sm:$0xff] %v2789_v13  ;;  %3794 = vst [vmem:[#allocation113_spill] sm:$0xff] %v2794_v7  ;;  %v2797_v16 = vld [vmem:[%s2175_s21 + $0x4d8] sm:$0xff]  ;;  %700 = vmatprep.subr.mxu1 %v2781_v12  ;;  %v2802_v5 = vld [vmem:[%s2175_s21 + $0xd0] sm:$0xff]  ;;  %630 = vmatpush1.msra.mxu0 %v2786_v8 }
  0xb5   : > { %3795 = vst [vmem:[#allocation114_spill] sm:$0xff] %v2797_v16  ;;  %3796 = vst [vmem:[#allocation115_spill] sm:$0xff] %v2802_v5  ;;  %v2805_v6 = vld [vmem:[%s2175_s21 + $0x4d0] sm:$0xff]  ;;  %701 = vmatpush1.msra.mxu1 %v2789_v13  ;;  %v2810_v10 = vld [vmem:[%s2175_s21 + $0xb8] sm:$0xff]  ;;  %631 = vmatprep.subr.mxu0 %v2794_v7 }
  0xb6   : > { %3797 = vst [vmem:[#allocation116_spill] sm:$0xff] %v2805_v6  ;;  %3798 = vst [vmem:[#allocation117_spill] sm:$0xff] %v2810_v10  ;;  %v2813_v9 = vld [vmem:[%s2175_s21 + $0x4b8] sm:$0xff]  ;;  %702 = vmatprep.subr.mxu1 %v2797_v16  ;;  %v2818_v12 = vld [vmem:[%s2175_s21 + $0xb0] sm:$0xff]  ;;  %632 = vmatpush1.msra.mxu0 %v2802_v5 }
  0xb7   : > { %3799 = vst [vmem:[#allocation118_spill] sm:$0xff] %v2813_v9  ;;  %3800 = vst [vmem:[#allocation119_spill] sm:$0xff] %v2818_v12  ;;  %v2821_v11 = vld [vmem:[%s2175_s21 + $0x4b0] sm:$0xff]  ;;  %703 = vmatpush1.msra.mxu1 %v2805_v6  ;;  %v2826_v13 = vld [vmem:[%s2175_s21 + $0x98] sm:$0xff]  ;;  %633 = vmatprep.subr.mxu0 %v2810_v10 }
  0xb8   : > { %3801 = vst [vmem:[#allocation120_spill] sm:$0xff] %v2821_v11  ;;  %3802 = vst [vmem:[#allocation121_spill] sm:$0xff] %v2826_v13  ;;  %v2829_v8 = vld [vmem:[%s2175_s21 + $0x498] sm:$0xff]  ;;  %704 = vmatprep.subr.mxu1 %v2813_v9  ;;  %v2834_v16 = vld [vmem:[%s2175_s21 + $0x90] sm:$0xff]  ;;  %634 = vmatpush1.msra.mxu0 %v2818_v12 }
  0xb9   : > { %3803 = vst [vmem:[#allocation122_spill] sm:$0xff] %v2829_v8  ;;  %3804 = vst [vmem:[#allocation123_spill] sm:$0xff] %v2834_v16  ;;  %v2837_v7 = vld [vmem:[%s2175_s21 + $0x490] sm:$0xff]  ;;  %705 = vmatpush1.msra.mxu1 %v2821_v11  ;;  %v2842_v6 = vld [vmem:[%s2175_s21 + $0x78] sm:$0xff]  ;;  %635 = vmatprep.subr.mxu0 %v2826_v13 }
  0xba   : > { %3805 = vst [vmem:[#allocation124_spill] sm:$0xff] %v2837_v7  ;;  %3806 = vst [vmem:[#allocation125_spill] sm:$0xff] %v2842_v6  ;;  %v2845_v5 = vld [vmem:[%s2175_s21 + $0x478] sm:$0xff]  ;;  %706 = vmatprep.subr.mxu1 %v2829_v8  ;;  %v2850_v9 = vld [vmem:[%s2175_s21 + $0x70] sm:$0xff]  ;;  %636 = vmatpush1.msra.mxu0 %v2834_v16 }
  0xbb   : > { %3807 = vst [vmem:[#allocation126_spill] sm:$0xff] %v2845_v5  ;;  %3808 = vst [vmem:[#allocation127_spill] sm:$0xff] %v2850_v9  ;;  %v2853_v10 = vld [vmem:[%s2175_s21 + $0x470] sm:$0xff]  ;;  %707 = vmatpush1.msra.mxu1 %v2837_v7  ;;  %v2858_v11 = vld [vmem:[%s2175_s21 + $0x58] sm:$0xff]  ;;  %637 = vmatprep.subr.mxu0 %v2842_v6 }
  0xbc   : > { %3809 = vst [vmem:[#allocation128_spill] sm:$0xff] %v2853_v10  ;;  %3810 = vst [vmem:[#allocation129_spill] sm:$0xff] %v2858_v11  ;;  %v2861_v12 = vld [vmem:[%s2175_s21 + $0x458] sm:$0xff]  ;;  %708 = vmatprep.subr.mxu1 %v2845_v5  ;;  %v2866_v8 = vld [vmem:[%s2175_s21 + $0x50] sm:$0xff]  ;;  %638 = vmatpush1.msra.mxu0 %v2850_v9 }
  0xbd   : > { %3811 = vst [vmem:[#allocation130_spill] sm:$0xff] %v2861_v12  ;;  %3812 = vst [vmem:[#allocation131_spill] sm:$0xff] %v2866_v8  ;;  %v2869_v13 = vld [vmem:[%s2175_s21 + $0x450] sm:$0xff]  ;;  %709 = vmatpush1.msra.mxu1 %v2853_v10  ;;  %v2874_v7 = vld [vmem:[%s2175_s21 + $0x38] sm:$0xff]  ;;  %639 = vmatprep.subr.mxu0 %v2858_v11 }
  0xbe   : > { %3813 = vst [vmem:[#allocation132_spill] sm:$0xff] %v2869_v13  ;;  %3814 = vst [vmem:[#allocation133_spill] sm:$0xff] %v2874_v7  ;;  %v2877_v16 = vld [vmem:[%s2175_s21 + $0x438] sm:$0xff]  ;;  %710 = vmatprep.subr.mxu1 %v2861_v12  ;;  %v2882_v5 = vld [vmem:[%s2175_s21 + $0x30] sm:$0xff]  ;;  %640 = vmatpush1.msra.mxu0 %v2866_v8 }
  0xbf   : > { %3815 = vst [vmem:[#allocation134_spill] sm:$0xff] %v2877_v16  ;;  %3816 = vst [vmem:[#allocation135_spill] sm:$0xff] %v2882_v5  ;;  %v2885_v6 = vld [vmem:[%s2175_s21 + $0x430] sm:$0xff]  ;;  %711 = vmatpush1.msra.mxu1 %v2869_v13  ;;  %v2890_v10 = vld [vmem:[%s2175_s21 + $0x18] sm:$0xff]  ;;  %641 = vmatprep.subr.mxu0 %v2874_v7 }
  0xc0   : > { %3817 = vst [vmem:[#allocation136_spill] sm:$0xff] %v2885_v6  ;;  %3818 = vst [vmem:[#allocation137_spill] sm:$0xff] %v2890_v10  ;;  %v2893_v9 = vld [vmem:[%s2175_s21 + $0x418] sm:$0xff]  ;;  %712 = vmatprep.subr.mxu1 %v2877_v16  ;;  %v2898_v12 = vld [vmem:[%s2175_s21 + $0x10] sm:$0xff]  ;;  %642 = vmatpush1.msra.mxu0 %v2882_v5 }
  0xc1   : > { %3819 = vst [vmem:[#allocation138_spill] sm:$0xff] %v2893_v9  ;;  %3820 = vst [vmem:[#allocation139_spill] sm:$0xff] %v2898_v12  ;;  %v2901_v11 = vld [vmem:[%s2175_s21 + $0x410] sm:$0xff]  ;;  %713 = vmatpush1.msra.mxu1 %v2885_v6  ;;  %v2906_v13 = vld [vmem:[%s2175_s21 + $0x3f8] sm:$0xff]  ;;  %643 = vmatprep.subr.mxu0 %v2890_v10 }
  0xc2   : > { %3821 = vst [vmem:[#allocation140_spill] sm:$0xff] %v2901_v11  ;;  %3822 = vst [vmem:[#allocation141_spill] sm:$0xff] %v2906_v13  ;;  %v2909_v8 = vld [vmem:[%s2175_s21 + $0x7f8] sm:$0xff]  ;;  %714 = vmatprep.subr.mxu1 %v2893_v9  ;;  %v2914_v16 = vld [vmem:[%s2175_s21 + $0x3f0] sm:$0xff]  ;;  %644 = vmatpush1.msra.mxu0 %v2898_v12 }
  0xc3   : > { %3823 = vst [vmem:[#allocation142_spill] sm:$0xff] %v2909_v8  ;;  %3824 = vst [vmem:[#allocation143_spill] sm:$0xff] %v2914_v16  ;;  %v2917_v7 = vld [vmem:[%s2175_s21 + $0x7f0] sm:$0xff]  ;;  %715 = vmatpush1.msra.mxu1 %v2901_v11  ;;  %v2922_v6 = vld [vmem:[%s2175_s21 + $0x3d8] sm:$0xff]  ;;  %645 = vmatprep.subr.mxu0 %v2906_v13 }
  0xc4   : > { %3825 = vst [vmem:[#allocation144_spill] sm:$0xff] %v2917_v7  ;;  %3826 = vst [vmem:[#allocation145_spill] sm:$0xff] %v2922_v6  ;;  %v2925_v5 = vld [vmem:[%s2175_s21 + $0x7d8] sm:$0xff]  ;;  %716 = vmatprep.subr.mxu1 %v2909_v8  ;;  %v2930_v9 = vld [vmem:[%s2175_s21 + $0x3d0] sm:$0xff]  ;;  %646 = vmatpush2.msra.mxu0 %v2914_v16 }
  0xc5   : > { %3827 = vst [vmem:[#allocation146_spill] sm:$0xff] %v2925_v5  ;;  %3828 = vst [vmem:[#allocation147_spill] sm:$0xff] %v2930_v9  ;;  %v2933_v10 = vld [vmem:[%s2175_s21 + $0x7d0] sm:$0xff]  ;;  %717 = vmatpush2.msra.mxu1 %v2917_v7  ;;  %v2938_v11 = vld [vmem:[%s2175_s21 + $0x3b8] sm:$0xff]  ;;  %647 = vmatprep.subr.mxu0 %v2922_v6 }
  0xc6   : > { %3829 = vst [vmem:[#allocation148_spill] sm:$0xff] %v2933_v10  ;;  %3830 = vst [vmem:[#allocation149_spill] sm:$0xff] %v2938_v11  ;;  %v2941_v12 = vld [vmem:[%s2175_s21 + $0x7b8] sm:$0xff]  ;;  %718 = vmatprep.subr.mxu1 %v2925_v5  ;;  %v2946_v8 = vld [vmem:[%s2175_s21 + $0x3b0] sm:$0xff]  ;;  %648 = vmatpush2.msra.mxu0 %v2930_v9 }
  0xc7   : > { %3831 = vst [vmem:[#allocation150_spill] sm:$0xff] %v2941_v12  ;;  %3832 = vst [vmem:[#allocation151_spill] sm:$0xff] %v2946_v8  ;;  %v2949_v13 = vld [vmem:[%s2175_s21 + $0x7b0] sm:$0xff]  ;;  %719 = vmatpush2.msra.mxu1 %v2933_v10  ;;  %v2954_v7 = vld [vmem:[%s2175_s21 + $0x398] sm:$0xff]  ;;  %649 = vmatprep.subr.mxu0 %v2938_v11 }
  0xc8   : > { %3833 = vst [vmem:[#allocation152_spill] sm:$0xff] %v2949_v13  ;;  %3834 = vst [vmem:[#allocation153_spill] sm:$0xff] %v2954_v7  ;;  %v2957_v16 = vld [vmem:[%s2175_s21 + $0x798] sm:$0xff]  ;;  %720 = vmatprep.subr.mxu1 %v2941_v12  ;;  %v2962_v5 = vld [vmem:[%s2175_s21 + $0x390] sm:$0xff]  ;;  %650 = vmatpush2.msra.mxu0 %v2946_v8 }
  0xc9   : > { %3835 = vst [vmem:[#allocation154_spill] sm:$0xff] %v2957_v16  ;;  %3836 = vst [vmem:[#allocation155_spill] sm:$0xff] %v2962_v5  ;;  %v2965_v6 = vld [vmem:[%s2175_s21 + $0x790] sm:$0xff]  ;;  %721 = vmatpush2.msra.mxu1 %v2949_v13  ;;  %v2970_v10 = vld [vmem:[%s2175_s21 + $0x378] sm:$0xff]  ;;  %651 = vmatprep.subr.mxu0 %v2954_v7 }
  0xca   : > { %3837 = vst [vmem:[#allocation156_spill] sm:$0xff] %v2965_v6  ;;  %3838 = vst [vmem:[#allocation157_spill] sm:$0xff] %v2970_v10  ;;  %v2973_v9 = vld [vmem:[%s2175_s21 + $0x778] sm:$0xff]  ;;  %722 = vmatprep.subr.mxu1 %v2957_v16  ;;  %v2978_v12 = vld [vmem:[%s2175_s21 + $0x370] sm:$0xff]  ;;  %652 = vmatpush2.msra.mxu0 %v2962_v5 }
  0xcb   : > { %3839 = vst [vmem:[#allocation158_spill] sm:$0xff] %v2973_v9  ;;  %3840 = vst [vmem:[#allocation159_spill] sm:$0xff] %v2978_v12  ;;  %v2981_v11 = vld [vmem:[%s2175_s21 + $0x770] sm:$0xff]  ;;  %723 = vmatpush2.msra.mxu1 %v2965_v6  ;;  %v2986_v13 = vld [vmem:[%s2175_s21 + $0x358] sm:$0xff]  ;;  %653 = vmatprep.subr.mxu0 %v2970_v10 }
  0xcc   : > { %3841 = vst [vmem:[#allocation160_spill] sm:$0xff] %v2981_v11  ;;  %3842 = vst [vmem:[#allocation161_spill] sm:$0xff] %v2986_v13  ;;  %v2989_v8 = vld [vmem:[%s2175_s21 + $0x758] sm:$0xff]  ;;  %724 = vmatprep.subr.mxu1 %v2973_v9  ;;  %v2994_v16 = vld [vmem:[%s2175_s21 + $0x350] sm:$0xff]  ;;  %654 = vmatpush2.msra.mxu0 %v2978_v12 }
  0xcd   : > { %3843 = vst [vmem:[#allocation162_spill] sm:$0xff] %v2989_v8  ;;  %3844 = vst [vmem:[#allocation163_spill] sm:$0xff] %v2994_v16  ;;  %v2997_v7 = vld [vmem:[%s2175_s21 + $0x750] sm:$0xff]  ;;  %725 = vmatpush2.msra.mxu1 %v2981_v11  ;;  %v3002_v6 = vld [vmem:[%s2175_s21 + $0x338] sm:$0xff]  ;;  %655 = vmatprep.subr.mxu0 %v2986_v13 }
  0xce   : > { %3845 = vst [vmem:[#allocation164_spill] sm:$0xff] %v2997_v7  ;;  %3846 = vst [vmem:[#allocation165_spill] sm:$0xff] %v3002_v6  ;;  %v3005_v5 = vld [vmem:[%s2175_s21 + $0x738] sm:$0xff]  ;;  %726 = vmatprep.subr.mxu1 %v2989_v8  ;;  %v3010_v9 = vld [vmem:[%s2175_s21 + $0x330] sm:$0xff]  ;;  %656 = vmatpush2.msra.mxu0 %v2994_v16 }
  0xcf   : > { %3847 = vst [vmem:[#allocation166_spill] sm:$0xff] %v3005_v5  ;;  %3848 = vst [vmem:[#allocation167_spill] sm:$0xff] %v3010_v9  ;;  %v3013_v10 = vld [vmem:[%s2175_s21 + $0x730] sm:$0xff]  ;;  %727 = vmatpush2.msra.mxu1 %v2997_v7  ;;  %v3018_v11 = vld [vmem:[%s2175_s21 + $0x318] sm:$0xff]  ;;  %657 = vmatprep.subr.mxu0 %v3002_v6 }
  0xd0   : > { %3849 = vst [vmem:[#allocation168_spill] sm:$0xff] %v3013_v10  ;;  %3850 = vst [vmem:[#allocation169_spill] sm:$0xff] %v3018_v11  ;;  %v3021_v12 = vld [vmem:[%s2175_s21 + $0x718] sm:$0xff]  ;;  %728 = vmatprep.subr.mxu1 %v3005_v5  ;;  %v3026_v8 = vld [vmem:[%s2175_s21 + $0x310] sm:$0xff]  ;;  %658 = vmatpush2.msra.mxu0 %v3010_v9 }
  0xd1   : > { %3851 = vst [vmem:[#allocation170_spill] sm:$0xff] %v3021_v12  ;;  %3852 = vst [vmem:[#allocation171_spill] sm:$0xff] %v3026_v8  ;;  %v3029_v13 = vld [vmem:[%s2175_s21 + $0x710] sm:$0xff]  ;;  %729 = vmatpush2.msra.mxu1 %v3013_v10  ;;  %v3034_v7 = vld [vmem:[%s2175_s21 + $0x2f8] sm:$0xff]  ;;  %659 = vmatprep.subr.mxu0 %v3018_v11 }
  0xd2   : > { %3853 = vst [vmem:[#allocation172_spill] sm:$0xff] %v3029_v13  ;;  %3854 = vst [vmem:[#allocation173_spill] sm:$0xff] %v3034_v7  ;;  %v3037_v16 = vld [vmem:[%s2175_s21 + $0x6f8] sm:$0xff]  ;;  %730 = vmatprep.subr.mxu1 %v3021_v12  ;;  %v3042_v5 = vld [vmem:[%s2175_s21 + $0x2f0] sm:$0xff]  ;;  %660 = vmatpush2.msra.mxu0 %v3026_v8 }
  0xd3   : > { %3855 = vst [vmem:[#allocation174_spill] sm:$0xff] %v3037_v16  ;;  %3856 = vst [vmem:[#allocation175_spill] sm:$0xff] %v3042_v5  ;;  %v3045_v6 = vld [vmem:[%s2175_s21 + $0x6f0] sm:$0xff]  ;;  %731 = vmatpush2.msra.mxu1 %v3029_v13  ;;  %v3050_v10 = vld [vmem:[%s2175_s21 + $0x2d8] sm:$0xff]  ;;  %661 = vmatprep.subr.mxu0 %v3034_v7 }
  0xd4   : > { %3857 = vst [vmem:[#allocation176_spill] sm:$0xff] %v3045_v6  ;;  %3858 = vst [vmem:[#allocation177_spill] sm:$0xff] %v3050_v10  ;;  %v3053_v9 = vld [vmem:[%s2175_s21 + $0x6d8] sm:$0xff]  ;;  %732 = vmatprep.subr.mxu1 %v3037_v16  ;;  %v3058_v12 = vld [vmem:[%s2175_s21 + $0x2d0] sm:$0xff]  ;;  %662 = vmatpush2.msra.mxu0 %v3042_v5 }
  0xd5   : > { %3859 = vst [vmem:[#allocation178_spill] sm:$0xff] %v3053_v9  ;;  %3860 = vst [vmem:[#allocation179_spill] sm:$0xff] %v3058_v12  ;;  %v3061_v11 = vld [vmem:[%s2175_s21 + $0x6d0] sm:$0xff]  ;;  %733 = vmatpush2.msra.mxu1 %v3045_v6  ;;  %v3066_v13 = vld [vmem:[%s2175_s21 + $0x2b8] sm:$0xff]  ;;  %663 = vmatprep.subr.mxu0 %v3050_v10 }
  0xd6   : > { %3861 = vst [vmem:[#allocation180_spill] sm:$0xff] %v3061_v11  ;;  %3862 = vst [vmem:[#allocation181_spill] sm:$0xff] %v3066_v13  ;;  %v3069_v8 = vld [vmem:[%s2175_s21 + $0x6b8] sm:$0xff]  ;;  %734 = vmatprep.subr.mxu1 %v3053_v9  ;;  %v3074_v16 = vld [vmem:[%s2175_s21 + $0x2b0] sm:$0xff]  ;;  %664 = vmatpush2.msra.mxu0 %v3058_v12 }
  0xd7   : > { %3863 = vst [vmem:[#allocation182_spill] sm:$0xff] %v3069_v8  ;;  %3864 = vst [vmem:[#allocation183_spill] sm:$0xff] %v3074_v16  ;;  %v3077_v7 = vld [vmem:[%s2175_s21 + $0x6b0] sm:$0xff]  ;;  %735 = vmatpush2.msra.mxu1 %v3061_v11  ;;  %v3082_v6 = vld [vmem:[%s2175_s21 + $0x298] sm:$0xff]  ;;  %665 = vmatprep.subr.mxu0 %v3066_v13 }
  0xd8   : > { %3865 = vst [vmem:[#allocation184_spill] sm:$0xff] %v3077_v7  ;;  %3866 = vst [vmem:[#allocation185_spill] sm:$0xff] %v3082_v6  ;;  %v3085_v5 = vld [vmem:[%s2175_s21 + $0x698] sm:$0xff]  ;;  %736 = vmatprep.subr.mxu1 %v3069_v8  ;;  %v3090_v9 = vld [vmem:[%s2175_s21 + $0x290] sm:$0xff]  ;;  %666 = vmatpush2.msra.mxu0 %v3074_v16 }
  0xd9   : > { %3867 = vst [vmem:[#allocation186_spill] sm:$0xff] %v3085_v5  ;;  %3868 = vst [vmem:[#allocation187_spill] sm:$0xff] %v3090_v9  ;;  %v3093_v10 = vld [vmem:[%s2175_s21 + $0x690] sm:$0xff]  ;;  %737 = vmatpush2.msra.mxu1 %v3077_v7  ;;  %v3098_v11 = vld [vmem:[%s2175_s21 + $0x278] sm:$0xff]  ;;  %667 = vmatprep.subr.mxu0 %v3082_v6 }
  0xda   : > { %3869 = vst [vmem:[#allocation188_spill] sm:$0xff] %v3093_v10  ;;  %3870 = vst [vmem:[#allocation189_spill] sm:$0xff] %v3098_v11  ;;  %v3101_v12 = vld [vmem:[%s2175_s21 + $0x678] sm:$0xff]  ;;  %738 = vmatprep.subr.mxu1 %v3085_v5  ;;  %v3106_v8 = vld [vmem:[%s2175_s21 + $0x270] sm:$0xff]  ;;  %668 = vmatpush2.msra.mxu0 %v3090_v9 }
  0xdb   : > { %3871 = vst [vmem:[#allocation190_spill] sm:$0xff] %v3101_v12  ;;  %3872 = vst [vmem:[#allocation191_spill] sm:$0xff] %v3106_v8  ;;  %v3109_v13 = vld [vmem:[%s2175_s21 + $0x670] sm:$0xff]  ;;  %739 = vmatpush2.msra.mxu1 %v3093_v10  ;;  %v3114_v7 = vld [vmem:[%s2175_s21 + $0x258] sm:$0xff]  ;;  %669 = vmatprep.subr.mxu0 %v3098_v11 }
  0xdc   : > { %3873 = vst [vmem:[#allocation192_spill] sm:$0xff] %v3109_v13  ;;  %3874 = vst [vmem:[#allocation193_spill] sm:$0xff] %v3114_v7  ;;  %v3117_v16 = vld [vmem:[%s2175_s21 + $0x658] sm:$0xff]  ;;  %740 = vmatprep.subr.mxu1 %v3101_v12  ;;  %v3122_v5 = vld [vmem:[%s2175_s21 + $0x250] sm:$0xff]  ;;  %670 = vmatpush2.msra.mxu0 %v3106_v8 }
  0xdd   : > { %3875 = vst [vmem:[#allocation194_spill] sm:$0xff] %v3122_v5  ;;  %v3125_v6 = vld [vmem:[%s2175_s21 + $0x650] sm:$0xff]  ;;  %741 = vmatpush2.msra.mxu1 %v3109_v13  ;;  %v3130_v10 = vld [vmem:[%s2175_s21 + $0x238] sm:$0xff]  ;;  %671 = vmatprep.subr.mxu0 %v3114_v7 }
  0xde   : > { %v3133_v9 = vld [vmem:[%s2175_s21 + $0x638] sm:$0xff]  ;;  %742 = vmatprep.subr.mxu1 %v3117_v16  ;;  %v3138_v11 = vld [vmem:[%s2175_s21 + $0x230] sm:$0xff]  ;;  %672 = vmatpush2.msra.mxu0 %v3122_v5 }
  0xdf   : > { %3876 = vst [vmem:[#allocation195_spill] sm:$0xff] %v3138_v11  ;;  %v3141_v12 = vld [vmem:[%s2175_s21 + $0x630] sm:$0xff]  ;;  %743 = vmatpush2.msra.mxu1 %v3125_v6  ;;  %v3146_v8 = vld [vmem:[%s2175_s21 + $0x218] sm:$0xff]  ;;  %673 = vmatprep.subr.mxu0 %v3130_v10 }
  0xe0   : > { %3877 = vst [vmem:[#allocation196_spill] sm:$0xff] %v3141_v12  ;;  %3878 = vst [vmem:[#allocation197_spill] sm:$0xff] %v3146_v8  ;;  %v3149_v13 = vld [vmem:[%s2175_s21 + $0x618] sm:$0xff]  ;;  %744 = vmatprep.subr.mxu1 %v3133_v9  ;;  %v3154_v7 = vld [vmem:[%s2175_s21 + $0x210] sm:$0xff]  ;;  %674 = vmatpush2.msra.mxu0 %v3138_v11 }
  0xe1   : > { %3879 = vst [vmem:[#allocation198_spill] sm:$0xff] %v3149_v13  ;;  %3880 = vst [vmem:[#allocation199_spill] sm:$0xff] %v3154_v7  ;;  %745 = vmatpush2.msra.mxu1 %v3141_v12  ;;  %v3159_v5 = vld [vmem:[%s2175_s21 + $0x610] sm:$0xff]  ;;  %675 = vmatprep.subr.mxu0 %v3146_v8  ;;  %v1849_v12 = vld [vmem:[%s2175_s21 + $0x1e8] sm:$0xff] }
  0xe2   : > { %3881 = vst [vmem:[#allocation200_spill] sm:$0xff] %v3159_v5  ;;  %746 = vmatprep.subr.mxu1 %v3149_v13  ;;  %676 = vmatpush2.msra.mxu0 %v3154_v7  ;;  %v1850_v8 = vld [vmem:[%s2175_s21 + $0x5e8] sm:$0xff]  ;;  %v1851_v7 = vld [vmem:[%s2175_s21 + $0x1e0] sm:$0xff] }
  0xe3   : > { %677 = vmatprep.mubr.f32.mxu0 %v2632_v14  ;;  %747 = vmatpush2.msra.mxu1 %v3159_v5  ;;  %v1852_v14 = vld [vmem:[%s2175_s21 + $0x5e0] sm:$0xff]  ;;  %v1853_v5 = vld [vmem:[%s2175_s21 + $0x1c8] sm:$0xff] }
  0xe4   : > { %748 = vmatprep.mubr.f32.mxu1 %v2639_v15  ;;  %678 = vmatmul.mubr.f32.vlgmr.msra.gmra.mxu0 %v2643_v18  ;;  %v1854_v15 = vld [vmem:[%s2175_s21 + $0x5c8] sm:$0xff]  ;;  %v1855_v18 = vld [vmem:[%s2175_s21 + $0x1c0] sm:$0xff] }
  0xe5   : > { %749 = vmatmul.mubr.f32.vlgmr.msra.gmra.mxu1 %v2645_v17  ;;  %759 = vmatprep.subr.mxu0 %v1849_v12  ;;  %v1856_v17 = vld [vmem:[%s2175_s21 + $0x5c0] sm:$0xff]  ;;  %v1857_v12 = vld [vmem:[%s2175_s21 + $0x1a8] sm:$0xff] }
  0xe6   : > { %830 = vmatprep.subr.mxu1 %v1850_v8  ;;  %760 = vmatpush1.msra.mxu0 %v1851_v7  ;;  %v1858_v8 = vld [vmem:[%s2175_s21 + $0x5a8] sm:$0xff]  ;;  %v1859_v7 = vld [vmem:[%s2175_s21 + $0x1a0] sm:$0xff] }
  0xe7   : > { %831 = vmatpush1.msra.mxu1 %v1852_v14  ;;  %761 = vmatprep.subr.mxu0 %v1853_v5  ;;  %v1860_v14 = vld [vmem:[%s2175_s21 + $0x5a0] sm:$0xff]  ;;  %v1861_v5 = vld [vmem:[%s2175_s21 + $0x188] sm:$0xff] }
  0xe8   : > { %832 = vmatprep.subr.mxu1 %v1854_v15  ;;  %762 = vmatpush1.msra.mxu0 %v1855_v18  ;;  %v1862_v13 = vld [vmem:[%s2175_s21 + $0x588] sm:$0xff]  ;;  %v1863_v15 = vld [vmem:[%s2175_s21 + $0x180] sm:$0xff] }
  0xe9   : > { %833 = vmatpush1.msra.mxu1 %v1856_v17  ;;  %763 = vmatprep.subr.mxu0 %v1857_v12  ;;  %v1864_v18 = vld [vmem:[%s2175_s21 + $0x580] sm:$0xff]  ;;  %v1865_v11 = vld [vmem:[%s2175_s21 + $0x168] sm:$0xff] }
  0xea   : > { %834 = vmatprep.subr.mxu1 %v1858_v8  ;;  %764 = vmatpush1.msra.mxu0 %v1859_v7  ;;  %v1866_v17 = vld [vmem:[%s2175_s21 + $0x568] sm:$0xff] }
  0xeb   : > { %835 = vmatpush1.msra.mxu1 %v1860_v14  ;;  %765 = vmatprep.subr.mxu0 %v1861_v5  ;;  %v3934_v12 = vld [vmem:[#allocation69_spill] sm:$0xff]  ;;  %v3935_v8 = vld [vmem:[#allocation70_spill] sm:$0xff]  ;;  %v3936_v14 = vld [vmem:[#allocation71_spill] sm:$0xff] }
  0xec   : > { %836 = vmatprep.subr.mxu1 %v1862_v13  ;;  %766 = vmatpush1.msra.mxu0 %v1863_v15  ;;  %v3933_v13 = vld [vmem:[#allocation68_spill] sm:$0xff]  ;;  %v3291_v7 = vld [vmem:[#allocation9 + $0x8] sm:$0xff] }
  0xed   : > { %837 = vmatpush1.msra.mxu1 %v1864_v18  ;;  %767 = vmatprep.subr.mxu0 %v1865_v11  ;;  %v3932_v11 = vld [vmem:[#allocation67_spill] sm:$0xff]  ;;  %v3937_v5 = vld [vmem:[#allocation72_spill] sm:$0xff]  ;;  %v3938_v18 = vld [vmem:[#allocation73_spill] sm:$0xff] }
  0xee   : > { %838 = vmatprep.subr.mxu1 %v1866_v17  ;;  %768 = vmatpush1.msra.mxu0 %v2202_v19  ;;  %v3882_v19 = vld [vmem:[#allocation17_spill] sm:$0xff]  ;;  %v3295_v15 = vld [vmem:[#allocation9 + $0x18] sm:$0xff]  ;;  %v3939_v17 = vld [vmem:[#allocation74_spill] sm:$0xff] }
  0xef   : > { %839 = vmatpush1.msra.mxu1 %v2205_v20  ;;  %769 = vmatprep.subr.mxu0 %v2208_v21  ;;  %v3883_v20 = vld [vmem:[#allocation18_spill] sm:$0xff]  ;;  %v3884_v21 = vld [vmem:[#allocation19_spill] sm:$0xff] }
  0xf0   : > { %840 = vmatprep.subr.mxu1 %v2211_v22  ;;  %770 = vmatpush1.msra.mxu0 %v2214_v23  ;;  %v3885_v22 = vld [vmem:[#allocation20_spill] sm:$0xff]  ;;  %v3886_v23 = vld [vmem:[#allocation21_spill] sm:$0xff] }
  0xf1   : > { %841 = vmatpush1.msra.mxu1 %v2217_v24  ;;  %771 = vmatprep.subr.mxu0 %v2222_v25  ;;  %v3887_v24 = vld [vmem:[#allocation22_spill] sm:$0xff]  ;;  %v3888_v25 = vld [vmem:[#allocation23_spill] sm:$0xff] }
  0xf2   : > { %842 = vmatprep.subr.mxu1 %v2225_v26  ;;  %772 = vmatpush1.msra.mxu0 %v2230_v27  ;;  %v3889_v26 = vld [vmem:[#allocation24_spill] sm:$0xff]  ;;  %v3890_v27 = vld [vmem:[#allocation25_spill] sm:$0xff] }
  0xf3   : > { %843 = vmatpush1.msra.mxu1 %v2233_v28  ;;  %773 = vmatprep.subr.mxu0 %v2238_v29  ;;  %v3891_v28 = vld [vmem:[#allocation26_spill] sm:$0xff]  ;;  %v3892_v29 = vld [vmem:[#allocation27_spill] sm:$0xff] }
  0xf4   : > { %844 = vmatprep.subr.mxu1 %v2241_v30  ;;  %774 = vmatpush1.msra.mxu0 %v2246_v31  ;;  %v3893_v30 = vld [vmem:[#allocation28_spill] sm:$0xff]  ;;  %v3894_v31 = vld [vmem:[#allocation29_spill] sm:$0xff] }
  0xf5   : > { %845 = vmatpush1.msra.mxu1 %v2249_v32  ;;  %775 = vmatprep.subr.mxu0 %v2254_v33  ;;  %v3895_v32 = vld [vmem:[#allocation30_spill] sm:$0xff]  ;;  %v3896_v33 = vld [vmem:[#allocation31_spill] sm:$0xff] }
  0xf6   : > { %846 = vmatprep.subr.mxu1 %v2257_v34  ;;  %776 = vmatpush1.msra.mxu0 %v2262_v35  ;;  %v3897_v34 = vld [vmem:[#allocation32_spill] sm:$0xff]  ;;  %v3898_v35 = vld [vmem:[#allocation33_spill] sm:$0xff] }
  0xf7   : > { %847 = vmatpush1.msra.mxu1 %v2265_v36  ;;  %777 = vmatprep.subr.mxu0 %v2270_v37  ;;  %v3899_v36 = vld [vmem:[#allocation34_spill] sm:$0xff]  ;;  %v3900_v37 = vld [vmem:[#allocation35_spill] sm:$0xff] }
  0xf8   : > { %848 = vmatprep.subr.mxu1 %v2273_v38  ;;  %778 = vmatpush1.msra.mxu0 %v2278_v39  ;;  %v3901_v38 = vld [vmem:[#allocation36_spill] sm:$0xff]  ;;  %v3902_v39 = vld [vmem:[#allocation37_spill] sm:$0xff] }
  0xf9   : > { %849 = vmatpush1.msra.mxu1 %v2281_v40  ;;  %779 = vmatprep.subr.mxu0 %v2286_v41  ;;  %v3903_v40 = vld [vmem:[#allocation38_spill] sm:$0xff]  ;;  %v3904_v41 = vld [vmem:[#allocation39_spill] sm:$0xff] }
  0xfa   : > { %850 = vmatprep.subr.mxu1 %v2289_v42  ;;  %780 = vmatpush1.msra.mxu0 %v2294_v43  ;;  %v3905_v42 = vld [vmem:[#allocation40_spill] sm:$0xff]  ;;  %v3906_v43 = vld [vmem:[#allocation41_spill] sm:$0xff] }
  0xfb   : > { %851 = vmatpush1.msra.mxu1 %v2297_v44  ;;  %781 = vmatprep.subr.mxu0 %v2302_v45  ;;  %v3907_v44 = vld [vmem:[#allocation42_spill] sm:$0xff]  ;;  %v3908_v45 = vld [vmem:[#allocation43_spill] sm:$0xff] }
  0xfc   : > { %852 = vmatprep.subr.mxu1 %v2305_v46  ;;  %782 = vmatpush1.msra.mxu0 %v2310_v47  ;;  %v3909_v46 = vld [vmem:[#allocation44_spill] sm:$0xff]  ;;  %v3910_v47 = vld [vmem:[#allocation45_spill] sm:$0xff] }
  0xfd   : > { %853 = vmatpush1.msra.mxu1 %v2313_v48  ;;  %783 = vmatprep.subr.mxu0 %v2318_v49  ;;  %v3911_v48 = vld [vmem:[#allocation46_spill] sm:$0xff]  ;;  %v3912_v49 = vld [vmem:[#allocation47_spill] sm:$0xff] }
  0xfe   : > { %854 = vmatprep.subr.mxu1 %v2321_v50  ;;  %784 = vmatpush1.msra.mxu0 %v2326_v51  ;;  %v3913_v50 = vld [vmem:[#allocation48_spill] sm:$0xff]  ;;  %v3914_v51 = vld [vmem:[#allocation49_spill] sm:$0xff] }
  0xff   : > { %855 = vmatpush1.msra.mxu1 %v2329_v52  ;;  %785 = vmatprep.subr.mxu0 %v2334_v53  ;;  %v3915_v52 = vld [vmem:[#allocation50_spill] sm:$0xff]  ;;  %v3916_v53 = vld [vmem:[#allocation51_spill] sm:$0xff] }
 0x100   : > { %856 = vmatprep.subr.mxu1 %v2337_v54  ;;  %786 = vmatpush1.msra.mxu0 %v2342_v55  ;;  %v3917_v54 = vld [vmem:[#allocation52_spill] sm:$0xff]  ;;  %v3918_v55 = vld [vmem:[#allocation53_spill] sm:$0xff] }
 0x101   : > { %857 = vmatpush1.msra.mxu1 %v2345_v56  ;;  %787 = vmatprep.subr.mxu0 %v2350_v57  ;;  %v3919_v56 = vld [vmem:[#allocation54_spill] sm:$0xff]  ;;  %v3920_v57 = vld [vmem:[#allocation55_spill] sm:$0xff] }
 0x102   : > { %858 = vmatprep.subr.mxu1 %v2353_v58  ;;  %788 = vmatpush1.msra.mxu0 %v2358_v59  ;;  %v3921_v58 = vld [vmem:[#allocation56_spill] sm:$0xff]  ;;  %v3922_v59 = vld [vmem:[#allocation57_spill] sm:$0xff] }
 0x103   : > { %859 = vmatpush1.msra.mxu1 %v2361_v60  ;;  %789 = vmatprep.subr.mxu0 %v2366_v61  ;;  %v3923_v60 = vld [vmem:[#allocation58_spill] sm:$0xff]  ;;  %v3924_v61 = vld [vmem:[#allocation59_spill] sm:$0xff] }
 0x104   : > { %860 = vmatprep.subr.mxu1 %v2369_v62  ;;  %790 = vmatpush1.msra.mxu0 %v2374_v63  ;;  %v3925_v62 = vld [vmem:[#allocation60_spill] sm:$0xff]  ;;  %v3926_v63 = vld [vmem:[#allocation61_spill] sm:$0xff] }
 0x105   : > { %861 = vmatpush1.msra.mxu1 %v2377_v0  ;;  %791 = vmatprep.subr.mxu0 %v2382_v1  ;;  %v3927_v0 = vld [vmem:[#allocation62_spill] sm:$0xff]  ;;  %v3928_v1 = vld [vmem:[#allocation63_spill] sm:$0xff] }
 0x106   : > { %862 = vmatprep.subr.mxu1 %v2385_v2  ;;  %792 = vmatpush2.msra.mxu0 %v2390_v3  ;;  %v3929_v2 = vld [vmem:[#allocation64_spill] sm:$0xff]  ;;  %v3930_v3 = vld [vmem:[#allocation65_spill] sm:$0xff] }
 0x107   : > { %863 = vmatpush2.msra.mxu1 %v2393_v4  ;;  %793 = vmatprep.subr.mxu0 %v3882_v19  ;;  %v3931_v4 = vld [vmem:[#allocation66_spill] sm:$0xff]  ;;  %v3299_v19 = vld [vmem:[#allocation9] sm:$0xff] }
 0x108   : > { %864 = vmatprep.subr.mxu1 %v3883_v20  ;;  %794 = vmatpush2.msra.mxu0 %v3884_v21  ;;  %v3301_v20 = vld [vmem:[#allocation9 + $0x10] sm:$0xff] }
 0x109   : > { %865 = vmatpush2.msra.mxu1 %v3885_v22  ;;  %795 = vmatprep.subr.mxu0 %v3886_v23  ;;  %v3940_v21 = vld [vmem:[#allocation75_spill] sm:$0xff]  ;;  %v3941_v22 = vld [vmem:[#allocation76_spill] sm:$0xff]  ;;  %v3942_v23 = vld [vmem:[#allocation77_spill] sm:$0xff] }
 0x10a   : > { %866 = vmatprep.subr.mxu1 %v3887_v24  ;;  %796 = vmatpush2.msra.mxu0 %v3888_v25  ;;  %v3943_v24 = vld [vmem:[#allocation78_spill] sm:$0xff]  ;;  %v3944_v25 = vld [vmem:[#allocation79_spill] sm:$0xff] }
 0x10b   : > { %867 = vmatpush2.msra.mxu1 %v3889_v26  ;;  %797 = vmatprep.subr.mxu0 %v3890_v27  ;;  %v3945_v26 = vld [vmem:[#allocation80_spill] sm:$0xff]  ;;  %v3946_v27 = vld [vmem:[#allocation81_spill] sm:$0xff] }
 0x10c   : > { %868 = vmatprep.subr.mxu1 %v3891_v28  ;;  %798 = vmatpush2.msra.mxu0 %v3892_v29  ;;  %v3947_v28 = vld [vmem:[#allocation82_spill] sm:$0xff]  ;;  %v3948_v29 = vld [vmem:[#allocation83_spill] sm:$0xff] }
 0x10d   : > { %869 = vmatpush2.msra.mxu1 %v3893_v30  ;;  %799 = vmatprep.subr.mxu0 %v3894_v31  ;;  %v3949_v30 = vld [vmem:[#allocation84_spill] sm:$0xff]  ;;  %v3950_v31 = vld [vmem:[#allocation85_spill] sm:$0xff] }
 0x10e   : > { %870 = vmatprep.subr.mxu1 %v3895_v32  ;;  %800 = vmatpush2.msra.mxu0 %v3896_v33  ;;  %v3951_v32 = vld [vmem:[#allocation86_spill] sm:$0xff]  ;;  %v3952_v33 = vld [vmem:[#allocation87_spill] sm:$0xff] }
 0x10f   : > { %871 = vmatpush2.msra.mxu1 %v3897_v34  ;;  %801 = vmatprep.subr.mxu0 %v3898_v35  ;;  %v3953_v34 = vld [vmem:[#allocation88_spill] sm:$0xff]  ;;  %v3954_v35 = vld [vmem:[#allocation89_spill] sm:$0xff] }
 0x110   : > { %872 = vmatprep.subr.mxu1 %v3899_v36  ;;  %802 = vmatpush2.msra.mxu0 %v3900_v37  ;;  %v3955_v36 = vld [vmem:[#allocation90_spill] sm:$0xff]  ;;  %v3956_v37 = vld [vmem:[#allocation91_spill] sm:$0xff] }
 0x111   : > { %873 = vmatpush2.msra.mxu1 %v3901_v38  ;;  %803 = vmatprep.subr.mxu0 %v3902_v39  ;;  %v3957_v38 = vld [vmem:[#allocation92_spill] sm:$0xff]  ;;  %v3958_v39 = vld [vmem:[#allocation93_spill] sm:$0xff] }
 0x112   : > { %874 = vmatprep.subr.mxu1 %v3903_v40  ;;  %804 = vmatpush2.msra.mxu0 %v3904_v41  ;;  %v3959_v40 = vld [vmem:[#allocation94_spill] sm:$0xff]  ;;  %v3960_v41 = vld [vmem:[#allocation95_spill] sm:$0xff] }
 0x113   : > { %875 = vmatpush2.msra.mxu1 %v3905_v42  ;;  %805 = vmatprep.subr.mxu0 %v3906_v43  ;;  %v3961_v42 = vld [vmem:[#allocation96_spill] sm:$0xff]  ;;  %v3962_v43 = vld [vmem:[#allocation97_spill] sm:$0xff] }
 0x114   : > { %876 = vmatprep.subr.mxu1 %v3907_v44  ;;  %806 = vmatpush2.msra.mxu0 %v3908_v45  ;;  %v3963_v44 = vld [vmem:[#allocation98_spill] sm:$0xff]  ;;  %v3964_v45 = vld [vmem:[#allocation99_spill] sm:$0xff] }
 0x115   : > { %877 = vmatpush2.msra.mxu1 %v3909_v46  ;;  %807 = vmatprep.subr.mxu0 %v3910_v47  ;;  %v3965_v46 = vld [vmem:[#allocation100_spill] sm:$0xff]  ;;  %v3966_v47 = vld [vmem:[#allocation101_spill] sm:$0xff] }
 0x116   : > { %878 = vmatprep.subr.mxu1 %v3911_v48  ;;  %808 = vmatpush2.msra.mxu0 %v3912_v49  ;;  %v3967_v48 = vld [vmem:[#allocation102_spill] sm:$0xff]  ;;  %v3968_v49 = vld [vmem:[#allocation103_spill] sm:$0xff] }
 0x117   : > { %879 = vmatpush2.msra.mxu1 %v3913_v50  ;;  %809 = vmatprep.subr.mxu0 %v3914_v51  ;;  %v3969_v50 = vld [vmem:[#allocation104_spill] sm:$0xff]  ;;  %v3970_v51 = vld [vmem:[#allocation105_spill] sm:$0xff] }
 0x118   : > { %880 = vmatprep.subr.mxu1 %v3915_v52  ;;  %810 = vmatpush2.msra.mxu0 %v3916_v53  ;;  %v3971_v52 = vld [vmem:[#allocation106_spill] sm:$0xff]  ;;  %v3972_v53 = vld [vmem:[#allocation107_spill] sm:$0xff] }
 0x119   : > { %881 = vmatpush2.msra.mxu1 %v3917_v54  ;;  %811 = vmatprep.subr.mxu0 %v3918_v55  ;;  %v3973_v54 = vld [vmem:[#allocation108_spill] sm:$0xff]  ;;  %v3974_v55 = vld [vmem:[#allocation109_spill] sm:$0xff] }
 0x11a   : > { %882 = vmatprep.subr.mxu1 %v3919_v56  ;;  %812 = vmatpush2.msra.mxu0 %v3920_v57  ;;  %v3975_v56 = vld [vmem:[#allocation110_spill] sm:$0xff]  ;;  %v3976_v57 = vld [vmem:[#allocation111_spill] sm:$0xff] }
 0x11b   : > { %883 = vmatpush2.msra.mxu1 %v3921_v58  ;;  %813 = vmatprep.subr.mxu0 %v3922_v59  ;;  %v3977_v58 = vld [vmem:[#allocation112_spill] sm:$0xff]  ;;  %v3978_v59 = vld [vmem:[#allocation113_spill] sm:$0xff] }
 0x11c   : > { %884 = vmatprep.subr.mxu1 %v3923_v60  ;;  %814 = vmatpush2.msra.mxu0 %v3924_v61  ;;  %v3979_v60 = vld [vmem:[#allocation114_spill] sm:$0xff]  ;;  %v3980_v61 = vld [vmem:[#allocation115_spill] sm:$0xff] }
 0x11d   : > { %885 = vmatpush2.msra.mxu1 %v3925_v62  ;;  %815 = vmatprep.subr.mxu0 %v3926_v63  ;;  %v3981_v62 = vld [vmem:[#allocation116_spill] sm:$0xff]  ;;  %v3982_v63 = vld [vmem:[#allocation117_spill] sm:$0xff] }
 0x11e   : > { %886 = vmatprep.subr.mxu1 %v3927_v0  ;;  %816 = vmatpush2.msra.mxu0 %v3928_v1  ;;  %v3983_v0 = vld [vmem:[#allocation118_spill] sm:$0xff]  ;;  %v3984_v1 = vld [vmem:[#allocation119_spill] sm:$0xff] }
 0x11f   : > { %887 = vmatpush2.msra.mxu1 %v3929_v2  ;;  %817 = vmatprep.subr.mxu0 %v3930_v3  ;;  %v3985_v2 = vld [vmem:[#allocation120_spill] sm:$0xff]  ;;  %v3986_v3 = vld [vmem:[#allocation121_spill] sm:$0xff] }
 0x120   : > { %888 = vmatprep.subr.mxu1 %v3931_v4  ;;  %818 = vmatpush2.msra.mxu0 %v3932_v11  ;;  %v3987_v4 = vld [vmem:[#allocation122_spill] sm:$0xff]  ;;  %v3988_v11 = vld [vmem:[#allocation123_spill] sm:$0xff] }
 0x121   : > { %889 = vmatpush2.msra.mxu1 %v3933_v13  ;;  %819 = vmatprep.subr.mxu0 %v3934_v12  ;;  %v3989_v13 = vld [vmem:[#allocation124_spill] sm:$0xff]  ;;  %v3990_v12 = vld [vmem:[#allocation125_spill] sm:$0xff] }
 0x122   : > { %890 = vmatprep.subr.mxu1 %v3935_v8  ;;  %820 = vmatpush2.msra.mxu0 %v3936_v14  ;;  %v3991_v8 = vld [vmem:[#allocation126_spill] sm:$0xff]  ;;  %v3992_v14 = vld [vmem:[#allocation127_spill] sm:$0xff] }
 0x123   : > { %891 = vmatpush2.msra.mxu1 %v3937_v5  ;;  %821 = vmatprep.subr.mxu0 %v3938_v18  ;;  %v3993_v5 = vld [vmem:[#allocation128_spill] sm:$0xff]  ;;  %v3994_v18 = vld [vmem:[#allocation129_spill] sm:$0xff] }
 0x124   : > { %892 = vmatprep.subr.mxu1 %v3939_v17  ;;  %822 = vmatpush2.msra.mxu0 %v3940_v21  ;;  %v3995_v17 = vld [vmem:[#allocation130_spill] sm:$0xff]  ;;  %v3996_v21 = vld [vmem:[#allocation131_spill] sm:$0xff] }
 0x125   : > { %823 = vmatprep.mubr.f32.mxu0 %v3291_v7  ;;  %893 = vmatpush2.msra.mxu1 %v3941_v22  ;;  %v3997_v22 = vld [vmem:[#allocation132_spill] sm:$0xff] }
 0x126   : > { %894 = vmatprep.mubr.f32.mxu1 %v3295_v15  ;;  %824 = vmatmul.mubr.f32.vlgmr.msra.gmra.mxu0 %v3299_v19 }
 0x127   : > { %895 = vmatmul.mubr.f32.vlgmr.msra.gmra.mxu1 %v3301_v20  ;;  %901 = vmatprep.subr.mxu0 %v3942_v23  ;;  %v3998_v23 = vld [vmem:[#allocation133_spill] sm:$0xff] }
 0x128   : > { %972 = vmatprep.subr.mxu1 %v3943_v24  ;;  %902 = vmatpush1.msra.mxu0 %v3944_v25  ;;  %v3999_v24 = vld [vmem:[#allocation134_spill] sm:$0xff]  ;;  %v4000_v25 = vld [vmem:[#allocation135_spill] sm:$0xff] }
 0x129   : > { %973 = vmatpush1.msra.mxu1 %v3945_v26  ;;  %903 = vmatprep.subr.mxu0 %v3946_v27  ;;  %v4001_v26 = vld [vmem:[#allocation136_spill] sm:$0xff]  ;;  %v4002_v27 = vld [vmem:[#allocation137_spill] sm:$0xff] }
 0x12a   : > { %974 = vmatprep.subr.mxu1 %v3947_v28  ;;  %904 = vmatpush1.msra.mxu0 %v3948_v29  ;;  %v4003_v28 = vld [vmem:[#allocation138_spill] sm:$0xff]  ;;  %v4004_v29 = vld [vmem:[#allocation139_spill] sm:$0xff] }
 0x12b   : > { %975 = vmatpush1.msra.mxu1 %v3949_v30  ;;  %905 = vmatprep.subr.mxu0 %v3950_v31  ;;  %v4005_v30 = vld [vmem:[#allocation140_spill] sm:$0xff]  ;;  %v4006_v31 = vld [vmem:[#allocation141_spill] sm:$0xff] }
 0x12c   : > { %976 = vmatprep.subr.mxu1 %v3951_v32  ;;  %906 = vmatpush1.msra.mxu0 %v3952_v33  ;;  %v4007_v32 = vld [vmem:[#allocation142_spill] sm:$0xff]  ;;  %v4008_v33 = vld [vmem:[#allocation143_spill] sm:$0xff] }
 0x12d   : > { %977 = vmatpush1.msra.mxu1 %v3953_v34  ;;  %907 = vmatprep.subr.mxu0 %v3954_v35  ;;  %v4009_v34 = vld [vmem:[#allocation144_spill] sm:$0xff]  ;;  %v4010_v35 = vld [vmem:[#allocation145_spill] sm:$0xff] }
 0x12e   : > { %978 = vmatprep.subr.mxu1 %v3955_v36  ;;  %908 = vmatpush1.msra.mxu0 %v3956_v37  ;;  %v4011_v36 = vld [vmem:[#allocation146_spill] sm:$0xff]  ;;  %v4012_v37 = vld [vmem:[#allocation147_spill] sm:$0xff] }
 0x12f   : > { %979 = vmatpush1.msra.mxu1 %v3957_v38  ;;  %909 = vmatprep.subr.mxu0 %v3958_v39  ;;  %v4013_v38 = vld [vmem:[#allocation148_spill] sm:$0xff]  ;;  %v4014_v39 = vld [vmem:[#allocation149_spill] sm:$0xff] }
 0x130   : > { %980 = vmatprep.subr.mxu1 %v3959_v40  ;;  %910 = vmatpush1.msra.mxu0 %v3960_v41  ;;  %v4015_v40 = vld [vmem:[#allocation150_spill] sm:$0xff]  ;;  %v4016_v41 = vld [vmem:[#allocation151_spill] sm:$0xff] }
 0x131   : > { %981 = vmatpush1.msra.mxu1 %v3961_v42  ;;  %911 = vmatprep.subr.mxu0 %v3962_v43  ;;  %v4017_v42 = vld [vmem:[#allocation152_spill] sm:$0xff]  ;;  %v4018_v43 = vld [vmem:[#allocation153_spill] sm:$0xff] }
 0x132   : > { %982 = vmatprep.subr.mxu1 %v3963_v44  ;;  %912 = vmatpush1.msra.mxu0 %v3964_v45  ;;  %v4019_v44 = vld [vmem:[#allocation154_spill] sm:$0xff]  ;;  %v4020_v45 = vld [vmem:[#allocation155_spill] sm:$0xff] }
 0x133   : > { %983 = vmatpush1.msra.mxu1 %v3965_v46  ;;  %913 = vmatprep.subr.mxu0 %v3966_v47  ;;  %v4021_v46 = vld [vmem:[#allocation156_spill] sm:$0xff]  ;;  %v4022_v47 = vld [vmem:[#allocation157_spill] sm:$0xff] }
 0x134   : > { %984 = vmatprep.subr.mxu1 %v3967_v48  ;;  %914 = vmatpush1.msra.mxu0 %v3968_v49  ;;  %v4023_v48 = vld [vmem:[#allocation158_spill] sm:$0xff]  ;;  %v4024_v49 = vld [vmem:[#allocation159_spill] sm:$0xff] }
 0x135   : > { %985 = vmatpush1.msra.mxu1 %v3969_v50  ;;  %915 = vmatprep.subr.mxu0 %v3970_v51  ;;  %v4025_v50 = vld [vmem:[#allocation160_spill] sm:$0xff]  ;;  %v4026_v51 = vld [vmem:[#allocation161_spill] sm:$0xff] }
 0x136   : > { %986 = vmatprep.subr.mxu1 %v3971_v52  ;;  %916 = vmatpush1.msra.mxu0 %v3972_v53  ;;  %v4027_v52 = vld [vmem:[#allocation162_spill] sm:$0xff]  ;;  %v4028_v53 = vld [vmem:[#allocation163_spill] sm:$0xff] }
 0x137   : > { %987 = vmatpush1.msra.mxu1 %v3973_v54  ;;  %917 = vmatprep.subr.mxu0 %v3974_v55  ;;  %v4029_v54 = vld [vmem:[#allocation164_spill] sm:$0xff]  ;;  %v4030_v55 = vld [vmem:[#allocation165_spill] sm:$0xff] }
 0x138   : > { %988 = vmatprep.subr.mxu1 %v3975_v56  ;;  %918 = vmatpush1.msra.mxu0 %v3976_v57  ;;  %v4031_v56 = vld [vmem:[#allocation166_spill] sm:$0xff]  ;;  %v4032_v57 = vld [vmem:[#allocation167_spill] sm:$0xff] }
 0x139   : > { %989 = vmatpush1.msra.mxu1 %v3977_v58  ;;  %919 = vmatprep.subr.mxu0 %v3978_v59  ;;  %v4033_v58 = vld [vmem:[#allocation168_spill] sm:$0xff]  ;;  %v4034_v59 = vld [vmem:[#allocation169_spill] sm:$0xff] }
 0x13a   : > { %990 = vmatprep.subr.mxu1 %v3979_v60  ;;  %920 = vmatpush1.msra.mxu0 %v3980_v61  ;;  %v4035_v60 = vld [vmem:[#allocation170_spill] sm:$0xff]  ;;  %v4036_v61 = vld [vmem:[#allocation171_spill] sm:$0xff] }
 0x13b   : > { %991 = vmatpush1.msra.mxu1 %v3981_v62  ;;  %921 = vmatprep.subr.mxu0 %v3982_v63  ;;  %v4037_v62 = vld [vmem:[#allocation172_spill] sm:$0xff]  ;;  %v4038_v63 = vld [vmem:[#allocation173_spill] sm:$0xff] }
 0x13c   : > { %992 = vmatprep.subr.mxu1 %v3983_v0  ;;  %922 = vmatpush1.msra.mxu0 %v3984_v1  ;;  %v4039_v0 = vld [vmem:[#allocation174_spill] sm:$0xff]  ;;  %v4040_v1 = vld [vmem:[#allocation175_spill] sm:$0xff] }
 0x13d   : > { %993 = vmatpush1.msra.mxu1 %v3985_v2  ;;  %923 = vmatprep.subr.mxu0 %v3986_v3  ;;  %v4041_v2 = vld [vmem:[#allocation176_spill] sm:$0xff]  ;;  %v4042_v3 = vld [vmem:[#allocation177_spill] sm:$0xff] }
 0x13e   : > { %994 = vmatprep.subr.mxu1 %v3987_v4  ;;  %924 = vmatpush1.msra.mxu0 %v3988_v11  ;;  %v4043_v4 = vld [vmem:[#allocation178_spill] sm:$0xff]  ;;  %v4044_v11 = vld [vmem:[#allocation179_spill] sm:$0xff] }
 0x13f   : > { %995 = vmatpush1.msra.mxu1 %v3989_v13  ;;  %925 = vmatprep.subr.mxu0 %v3990_v12  ;;  %v4045_v13 = vld [vmem:[#allocation180_spill] sm:$0xff]  ;;  %v4046_v12 = vld [vmem:[#allocation181_spill] sm:$0xff] }
 0x140   : > { %996 = vmatprep.subr.mxu1 %v3991_v8  ;;  %926 = vmatpush1.msra.mxu0 %v3992_v14  ;;  %v4047_v8 = vld [vmem:[#allocation182_spill] sm:$0xff]  ;;  %v4048_v14 = vld [vmem:[#allocation183_spill] sm:$0xff] }
 0x141   : > { %997 = vmatpush1.msra.mxu1 %v3993_v5  ;;  %927 = vmatprep.subr.mxu0 %v3994_v18  ;;  %v4049_v5 = vld [vmem:[#allocation184_spill] sm:$0xff]  ;;  %v4050_v18 = vld [vmem:[#allocation185_spill] sm:$0xff] }
 0x142   : > { %998 = vmatprep.subr.mxu1 %v3995_v17  ;;  %928 = vmatpush1.msra.mxu0 %v3996_v21  ;;  %v4051_v17 = vld [vmem:[#allocation186_spill] sm:$0xff]  ;;  %v4052_v21 = vld [vmem:[#allocation187_spill] sm:$0xff] }
 0x143   : > { %999 = vmatpush1.msra.mxu1 %v3997_v22  ;;  %929 = vmatprep.subr.mxu0 %v3998_v23  ;;  %v4053_v22 = vld [vmem:[#allocation188_spill] sm:$0xff]  ;;  %v4054_v23 = vld [vmem:[#allocation189_spill] sm:$0xff] }
 0x144   : > { %1000 = vmatprep.subr.mxu1 %v3999_v24  ;;  %930 = vmatpush1.msra.mxu0 %v4000_v25  ;;  %v4055_v24 = vld [vmem:[#allocation190_spill] sm:$0xff]  ;;  %v4056_v25 = vld [vmem:[#allocation191_spill] sm:$0xff] }
 0x145   : > { %1001 = vmatpush1.msra.mxu1 %v4001_v26  ;;  %931 = vmatprep.subr.mxu0 %v4002_v27  ;;  %v4057_v26 = vld [vmem:[#allocation192_spill] sm:$0xff]  ;;  %v4058_v27 = vld [vmem:[#allocation193_spill] sm:$0xff] }
 0x146   : > { %1002 = vmatprep.subr.mxu1 %v4003_v28  ;;  %932 = vmatpush1.msra.mxu0 %v4004_v29  ;;  %v4059_v28 = vld [vmem:[#allocation194_spill] sm:$0xff] }
 0x147   : > { %1003 = vmatpush1.msra.mxu1 %v4005_v30  ;;  %933 = vmatprep.subr.mxu0 %v4006_v31 }
 0x148   : > { %1004 = vmatprep.subr.mxu1 %v4007_v32  ;;  %934 = vmatpush2.msra.mxu0 %v4008_v33  ;;  %v4060_v32 = vld [vmem:[#allocation195_spill] sm:$0xff]  ;;  %v4061_v33 = vld [vmem:[#allocation196_spill] sm:$0xff] }
 0x149   : > { %1005 = vmatpush2.msra.mxu1 %v4009_v34  ;;  %935 = vmatprep.subr.mxu0 %v4010_v35 }
 0x14a   : > { %1006 = vmatprep.subr.mxu1 %v4011_v36  ;;  %936 = vmatpush2.msra.mxu0 %v4012_v37  ;;  %v4062_v36 = vld [vmem:[#allocation197_spill] sm:$0xff] }
 0x14b   : > { %1007 = vmatpush2.msra.mxu1 %v4013_v38  ;;  %937 = vmatprep.subr.mxu0 %v4014_v39 }
 0x14c   : > { %1008 = vmatprep.subr.mxu1 %v4015_v40  ;;  %938 = vmatpush2.msra.mxu0 %v4016_v41 }
 0x14d   : > { %1009 = vmatpush2.msra.mxu1 %v4017_v42  ;;  %939 = vmatprep.subr.mxu0 %v4018_v43 }
 0x14e   : > { %1010 = vmatprep.subr.mxu1 %v4019_v44  ;;  %940 = vmatpush2.msra.mxu0 %v4020_v45 }
 0x14f   : > { %1011 = vmatpush2.msra.mxu1 %v4021_v46  ;;  %941 = vmatprep.subr.mxu0 %v4022_v47 }
 0x150   : > { %1012 = vmatprep.subr.mxu1 %v4023_v48  ;;  %942 = vmatpush2.msra.mxu0 %v4024_v49 }
 0x151   : > { %1013 = vmatpush2.msra.mxu1 %v4025_v50  ;;  %943 = vmatprep.subr.mxu0 %v4026_v51 }
 0x152   : > { %1014 = vmatprep.subr.mxu1 %v4027_v52  ;;  %944 = vmatpush2.msra.mxu0 %v4028_v53 }
 0x153   : > { %1015 = vmatpush2.msra.mxu1 %v4029_v54  ;;  %945 = vmatprep.subr.mxu0 %v4030_v55 }
 0x154   : > { %1016 = vmatprep.subr.mxu1 %v4031_v56  ;;  %946 = vmatpush2.msra.mxu0 %v4032_v57 }
 0x155   : > { %1017 = vmatpush2.msra.mxu1 %v4033_v58  ;;  %947 = vmatprep.subr.mxu0 %v4034_v59 }
 0x156   : > { %1018 = vmatprep.subr.mxu1 %v4035_v60  ;;  %948 = vmatpush2.msra.mxu0 %v4036_v61 }
 0x157   : > { %1019 = vmatpush2.msra.mxu1 %v4037_v62  ;;  %949 = vmatprep.subr.mxu0 %v4038_v63 }
 0x158   : > { %1020 = vmatprep.subr.mxu1 %v4039_v0  ;;  %950 = vmatpush2.msra.mxu0 %v4040_v1 }
 0x159   : > { %1021 = vmatpush2.msra.mxu1 %v4041_v2  ;;  %951 = vmatprep.subr.mxu0 %v4042_v3 }
 0x15a   : > { %1022 = vmatprep.subr.mxu1 %v4043_v4  ;;  %952 = vmatpush2.msra.mxu0 %v4044_v11 }
 0x15b   : > { %1023 = vmatpush2.msra.mxu1 %v4045_v13  ;;  %953 = vmatprep.subr.mxu0 %v4046_v12 }
 0x15c   : > { %1024 = vmatprep.subr.mxu1 %v4047_v8  ;;  %954 = vmatpush2.msra.mxu0 %v4048_v14 }
 0x15d   : > { %1025 = vmatpush2.msra.mxu1 %v4049_v5  ;;  %955 = vmatprep.subr.mxu0 %v4050_v18 }
 0x15e   : > { %1026 = vmatprep.subr.mxu1 %v4051_v17  ;;  %956 = vmatpush2.msra.mxu0 %v4052_v21 }
 0x15f   : > { %1027 = vmatpush2.msra.mxu1 %v4053_v22  ;;  %957 = vmatprep.subr.mxu0 %v4054_v23 }
 0x160   : > { %1028 = vmatprep.subr.mxu1 %v4055_v24  ;;  %958 = vmatpush2.msra.mxu0 %v4056_v25 }
 0x161   : > { %1029 = vmatpush2.msra.mxu1 %v4057_v26  ;;  %959 = vmatprep.subr.mxu0 %v4058_v27 }
 0x162   : > { %1030 = vmatprep.subr.mxu1 %v3117_v16  ;;  %960 = vmatpush2.msra.mxu0 %v4059_v28  ;;  %v537_v29 = vpop.f32.mrf.mxu0  ;;  %v4063_v16 = vld [vmem:[#allocation198_spill] sm:$0xff] }
 0x163   : > { %1031 = vmatpush2.msra.mxu1 %v3125_v6  ;;  %v608_v30 = vpop.f32.mrf.mxu1  ;;  %961 = vmatprep.subr.mxu0 %v3130_v10  ;;  %v4064_v6 = vld [vmem:[#allocation199_spill] sm:$0xff]  ;;  %v4065_v10 = vld [vmem:[#allocation200_spill] sm:$0xff] }
 0x164   : > { %1032 = vmatprep.subr.mxu1 %v3133_v9  ;;  %v609_v31 = vadd.f32 %v608_v30, %v537_v29  ;;  %962 = vmatpush2.msra.mxu0 %v4060_v32  ;;  %v539_v34 = vpop.f32.mrf.mxu0 }
 0x165   : > { %1033 = vmatpush2.msra.mxu1 %v4061_v33  ;;  %v610_v35 = vpop.f32.mrf.mxu1  ;;  %963 = vmatprep.subr.mxu0 %v4062_v36 }
 0x166   : > { %1034 = vmatprep.subr.mxu1 %v4063_v16  ;;  %v1043_v37 = vrot.slane %v609_v31, 4  ;;  %v611_v38 = vadd.f32 %v610_v35, %v539_v34  ;;  %964 = vmatpush2.msra.mxu0 %v4064_v6 }
 0x167   : > { %965 = vmatprep.mubr.f32.mxu0 %v3291_v7  ;;  %1035 = vmatpush2.msra.mxu1 %v4065_v10 }
 0x168   : > { %1036 = vmatprep.mubr.f32.mxu1 %v3295_v15  ;;  %v1044_v9 = vadd.f32 %v1043_v37, %v609_v31  ;;  %v1049_v39 = vrot.slane %v611_v38, 4  ;;  %966 = vmatmul.mubr.f32.vlgmr.msra.gmra.mxu0 %v3299_v19 }
 0x169   : > { %1037 = vmatmul.mubr.f32.vlgmr.msra.gmra.mxu1 %v3301_v20 }
 0x16a   : > { %v1045_v40 = vrot.slane %v1044_v9, 2  ;;  %v1050_v41 = vadd.f32 %v1049_v39, %v611_v38 }
 0x16c   : > { %v1046_v42 = vadd.f32 %v1045_v40, %v1044_v9  ;;  %v1051_v43 = vrot.slane %v1050_v41, 2 }
 0x16e   : > { %v1047_v44 = vrot.slane %v1046_v42, 1  ;;  %v1052_v45 = vadd.f32 %v1051_v43, %v1050_v41 }
 0x170   : > { %v1048_v46 = vadd.f32 %v1047_v44, %v1046_v42  ;;  %v1053_v47 = vrot.slane %v1052_v45, 1 }
 0x172   : > { %v1068_v48 = vmul.f32 0.125, %v1048_v46  ;;  %v1054_v7 = vadd.f32 %v1053_v47, %v1052_v45 }
 0x174   : > { %v1072_v49 = vsub.f32 %v609_v31, %v1068_v48  ;;  %v1069_v50 = vmul.f32 0.125, %v1054_v7 }
 0x176   : > { %v1076_v51 = vmul.f32 %v1072_v49, %v1072_v49  ;;  %v1073_v15 = vsub.f32 %v611_v38, %v1069_v50 }
 0x178   : > { %v1080_v52 = vrot.slane %v1076_v51, 4  ;;  %v1077_v53 = vmul.f32 %v1073_v15, %v1073_v15 }
 0x17a   : > { %v1081_v54 = vadd.f32 %v1080_v52, %v1076_v51  ;;  %v1086_v19 = vrot.slane %v1077_v53, 4 }
 0x17c   : > { %v1082_v55 = vrot.slane %v1081_v54, 2  ;;  %v1087_v20 = vadd.f32 %v1086_v19, %v1077_v53 }
 0x17e   : > { %v1083_v56 = vadd.f32 %v1082_v55, %v1081_v54  ;;  %v1088_v57 = vrot.slane %v1087_v20, 2 }
 0x180   : > { %v1084_v58 = vrot.slane %v1083_v56, 1  ;;  %v1089_v59 = vadd.f32 %v1088_v57, %v1087_v20 }
 0x182   : > { %v1085_v60 = vadd.f32 %v1084_v58, %v1083_v56  ;;  %v1090_v61 = vrot.slane %v1089_v59, 1 }
 0x184   : > { %v1104_v62 = vmul.f32 0.125, %v1085_v60  ;;  %v1091_v63 = vadd.f32 %v1090_v61, %v1089_v59 }
 0x186   : > { %v1108_v0 = vadd.f32 1e-05, %v1104_v62  ;;  %v1105_v1 = vmul.f32 0.125, %v1091_v63 }
 0x188   : > { %1817 = vrsqrt.f32 %v1108_v0  ;;  %v1109_v2 = vadd.f32 1e-05, %v1105_v1 }
 0x18a   : > { %1819 = vrsqrt.f32 %v1109_v2 }
 0x195   : > { %v1818_v3 = vpop.eup %1817 }
 0x196   : > { %v1116_v4 = vmul.f32 %v1818_v3, %v1072_v49 }
 0x197   : > { %v1820_v11 = vpop.eup %1819 }
 0x198   : > { %v1120_v13 = vmul.f32 %v1116_v4, %v1116_v4  ;;  %v1117_v12 = vmul.f32 %v1820_v11, %v1073_v15 }
 0x19a   : > { %v1124_v8 = vrot.slane %v1120_v13, 4  ;;  %v1121_v14 = vmul.f32 %v1117_v12, %v1117_v12 }
 0x19c   : > { %v1125_v5 = vadd.f32 %v1124_v8, %v1120_v13  ;;  %v1130_v18 = vrot.slane %v1121_v14, 4 }
 0x19e   : > { %v1126_v17 = vrot.slane %v1125_v5, 2  ;;  %v1131_v21 = vadd.f32 %v1130_v18, %v1121_v14 }
 0x1a0   : > { %v1127_v22 = vadd.f32 %v1126_v17, %v1125_v5  ;;  %v1132_v23 = vrot.slane %v1131_v21, 2 }
 0x1a2   : > { %v1128_v24 = vrot.slane %v1127_v22, 1  ;;  %v1133_v25 = vadd.f32 %v1132_v23, %v1131_v21 }
 0x1a4   : > { %v1129_v26 = vadd.f32 %v1128_v24, %v1127_v22  ;;  %v1134_v27 = vrot.slane %v1133_v25, 1  ;;  %v679_v28 = vpop.f32.mrf.mxu0 }
 0x1a5   : > { %v750_v29 = vpop.f32.mrf.mxu1 }
 0x1a6   : > { %v1148_v30 = vmax.f32 %v1129_v26, 1e-24  ;;  %v751_v31 = vadd.f32 %v750_v29, %v679_v28  ;;  %v1135_v32 = vadd.f32 %v1134_v27, %v1133_v25  ;;  %v681_v33 = vpop.f32.mrf.mxu0 }
 0x1a7   : > { %v752_v34 = vpop.f32.mrf.mxu1 }
 0x1a8   : > { %v1055_v35 = vrot.slane %v751_v31, 4  ;;  %v753_v36 = vadd.f32 %v752_v34, %v681_v33  ;;  %v1149_v16 = vmax.f32 %v1135_v32, 1e-24  ;;  %1821 = vrsqrt.f32 %v1148_v30 }
 0x1aa   : > { %v1056_v37 = vadd.f32 %v1055_v35, %v751_v31  ;;  %v1061_v38 = vrot.slane %v753_v36, 4  ;;  %1823 = vrsqrt.f32 %v1149_v16 }
 0x1ac   : > { %v1057_v6 = vrot.slane %v1056_v37, 2  ;;  %v1062_v10 = vadd.f32 %v1061_v38, %v753_v36 }
 0x1ae   : > { %v1058_v9 = vadd.f32 %v1057_v6, %v1056_v37  ;;  %v1063_v39 = vrot.slane %v1062_v10, 2 }
 0x1b0   : > { %v1059_v40 = vrot.slane %v1058_v9, 1  ;;  %v1064_v41 = vadd.f32 %v1063_v39, %v1062_v10 }
 0x1b2   : > { %v1060_v42 = vadd.f32 %v1059_v40, %v1058_v9  ;;  %v1065_v43 = vrot.slane %v1064_v41, 1 }
 0x1b4   : > { %v1070_v44 = vmul.f32 0.125, %v1060_v42  ;;  %v1066_v45 = vadd.f32 %v1065_v43, %v1064_v41 }
 0x1b5   : > { %v1822_v46 = vpop.eup %1821 }
 0x1b6   : > { %v1074_v47 = vsub.f32 %v751_v31, %v1070_v44  ;;  %v1071_v48 = vmul.f32 0.125, %v1066_v45  ;;  %v3443_v15 = vmul.f32 %v1822_v46, %v1116_v4 }
 0x1b7   : > { %v1824_v7 = vpop.eup %1823 }
 0x1b8   : > { %v1078_v49 = vmul.f32 %v1074_v47, %v1074_v47  ;;  %v1075_v50 = vsub.f32 %v753_v36, %v1071_v48  ;;  %v3441_v51 = vmul.f32 %v1824_v7, %v1117_v12 }
 0x1ba   : > { %v1092_v52 = vrot.slane %v1078_v49, 4  ;;  %v1079_v53 = vmul.f32 %v1075_v50, %v1075_v50  ;;  %1368 = vmatprep.subr.mxu0 %v3441_v51  ;;  %1402 = vmatprep.mubr.f32.mxu0 %v3441_v51 }
 0x1bb   : > { %1369 = vmatpush1.xpose.msra.mxu0 %v3443_v15 }
 0x1bc   : > { %v1093_v54 = vadd.f32 %v1092_v52, %v1078_v49  ;;  %v1098_v19 = vrot.slane %v1079_v53, 4 }
 0x1be   : > { %v1094_v55 = vrot.slane %v1093_v54, 2  ;;  %v1099_v20 = vadd.f32 %v1098_v19, %v1079_v53  ;;  %1403 = vmatmul.mubr.f32.vlgmr.msra.gmra.mxu0 %v3443_v15 }
 0x1c0   : > { %v1095_v56 = vadd.f32 %v1094_v55, %v1093_v54  ;;  %v1100_v57 = vrot.slane %v1099_v20, 2 }
 0x1c2   : > { %v1096_v58 = vrot.slane %v1095_v56, 1  ;;  %v1101_v59 = vadd.f32 %v1100_v57, %v1099_v20 }
 0x1c4   : > { %v1097_v60 = vadd.f32 %v1096_v58, %v1095_v56  ;;  %v1102_v61 = vrot.slane %v1101_v59, 1 }
 0x1c6   : > { %v1106_v62 = vmul.f32 0.125, %v1097_v60  ;;  %v1103_v63 = vadd.f32 %v1102_v61, %v1101_v59 }
 0x1c8   : > { %v1110_v0 = vadd.f32 1e-05, %v1106_v62  ;;  %v1107_v1 = vmul.f32 0.125, %v1103_v63 }
 0x1ca   : > { %1825 = vrsqrt.f32 %v1110_v0  ;;  %v1111_v2 = vadd.f32 1e-05, %v1107_v1 }
 0x1cc   : > { %1827 = vrsqrt.f32 %v1111_v2 }
 0x1d7   : > { %v1826_v3 = vpop.eup %1825 }
 0x1d8   : > { %v1118_v4 = vmul.f32 %v1826_v3, %v1074_v47 }
 0x1d9   : > { %v1828_v11 = vpop.eup %1827 }
 0x1da   : > { %v1122_v13 = vmul.f32 %v1118_v4, %v1118_v4  ;;  %v1119_v12 = vmul.f32 %v1828_v11, %v1075_v50 }
 0x1dc   : > { %v1136_v8 = vrot.slane %v1122_v13, 4  ;;  %v1123_v14 = vmul.f32 %v1119_v12, %v1119_v12 }
 0x1de   : > { %v1137_v5 = vadd.f32 %v1136_v8, %v1122_v13  ;;  %v1142_v18 = vrot.slane %v1123_v14, 4 }
 0x1e0   : > { %v1138_v17 = vrot.slane %v1137_v5, 2  ;;  %v1143_v21 = vadd.f32 %v1142_v18, %v1123_v14 }
 0x1e2   : > { %v1139_v22 = vadd.f32 %v1138_v17, %v1137_v5  ;;  %v1144_v23 = vrot.slane %v1143_v21, 2 }
 0x1e4   : > { %v1140_v24 = vrot.slane %v1139_v22, 1  ;;  %v1145_v25 = vadd.f32 %v1144_v23, %v1143_v21 }
 0x1e6   : > { %v1141_v26 = vadd.f32 %v1140_v24, %v1139_v22  ;;  %v1146_v27 = vrot.slane %v1145_v25, 1  ;;  %v825_v28 = vpop.f32.mrf.mxu0 }
 0x1e7   : > { %v896_v29 = vpop.f32.mrf.mxu1 }
 0x1e8   : > { %v1150_v30 = vmax.f32 %v1141_v26, 1e-24  ;;  %v897_v31 = vadd.f32 %v896_v29, %v825_v28  ;;  %v1147_v32 = vadd.f32 %v1146_v27, %v1145_v25  ;;  %v827_v33 = vpop.f32.mrf.mxu0 }
 0x1e9   : > { %v898_v34 = vpop.f32.mrf.mxu1 }
 0x1ea   : > { %v1160_v35 = vrot.slane %v897_v31, 4  ;;  %v899_v36 = vadd.f32 %v898_v34, %v827_v33  ;;  %v1151_v16 = vmax.f32 %v1147_v32, 1e-24  ;;  %1829 = vrsqrt.f32 %v1150_v30 }
 0x1ec   : > { %v1161_v37 = vadd.f32 %v1160_v35, %v897_v31  ;;  %v1166_v38 = vrot.slane %v899_v36, 4  ;;  %1831 = vrsqrt.f32 %v1151_v16 }
 0x1ee   : > { %v1162_v6 = vrot.slane %v1161_v37, 2  ;;  %v1167_v10 = vadd.f32 %v1166_v38, %v899_v36 }
 0x1f0   : > { %v1163_v9 = vadd.f32 %v1162_v6, %v1161_v37  ;;  %v1168_v39 = vrot.slane %v1167_v10, 2 }
 0x1f2   : > { %v1164_v40 = vrot.slane %v1163_v9, 1  ;;  %v1169_v41 = vadd.f32 %v1168_v39, %v1167_v10 }
 0x1f4   : > { %v1165_v42 = vadd.f32 %v1164_v40, %v1163_v9  ;;  %v1170_v43 = vrot.slane %v1169_v41, 1 }
 0x1f6   : > { %v1184_v44 = vmul.f32 0.125, %v1165_v42  ;;  %v1171_v45 = vadd.f32 %v1170_v43, %v1169_v41 }
 0x1f7   : > { %v1830_v46 = vpop.eup %1829 }
 0x1f8   : > { %v1188_v47 = vsub.f32 %v897_v31, %v1184_v44  ;;  %v1185_v48 = vmul.f32 0.125, %v1171_v45  ;;  %v3451_v53 = vmul.f32 %v1830_v46, %v1118_v4 }
 0x1f9   : > { %v1832_v7 = vpop.eup %1831 }
 0x1fa   : > { %v1192_v49 = vmul.f32 %v1188_v47, %v1188_v47  ;;  %v1189_v50 = vsub.f32 %v899_v36, %v1185_v48  ;;  %v3449_v52 = vmul.f32 %v1832_v7, %v1119_v12 }
 0x1fc   : > { %v1196_v54 = vrot.slane %v1192_v49, 4  ;;  %v1193_v19 = vmul.f32 %v1189_v50, %v1189_v50  ;;  %1438 = vmatprep.subr.mxu1 %v3449_v52  ;;  %1472 = vmatprep.mubr.f32.mxu1 %v3449_v52 }
 0x1fd   : > { %1439 = vmatpush1.xpose.msra.mxu1 %v3451_v53 }
 0x1fe   : > { %v1197_v55 = vadd.f32 %v1196_v54, %v1192_v49  ;;  %v1202_v20 = vrot.slane %v1193_v19, 4 }
 0x200   : > { %v1198_v56 = vrot.slane %v1197_v55, 2  ;;  %v1203_v57 = vadd.f32 %v1202_v20, %v1193_v19  ;;  %1473 = vmatmul.mubr.f32.vlgmr.msra.gmra.mxu1 %v3451_v53 }
 0x202   : > { %v1199_v58 = vadd.f32 %v1198_v56, %v1197_v55  ;;  %v1204_v59 = vrot.slane %v1203_v57, 2 }
 0x204   : > { %v1200_v60 = vrot.slane %v1199_v58, 1  ;;  %v1205_v61 = vadd.f32 %v1204_v59, %v1203_v57 }
 0x206   : > { %v1201_v62 = vadd.f32 %v1200_v60, %v1199_v58  ;;  %v1206_v63 = vrot.slane %v1205_v61, 1 }
 0x208   : > { %v1220_v0 = vmul.f32 0.125, %v1201_v62  ;;  %v1207_v1 = vadd.f32 %v1206_v63, %v1205_v61 }
 0x20a   : > { %v1224_v2 = vadd.f32 1e-05, %v1220_v0  ;;  %v1221_v3 = vmul.f32 0.125, %v1207_v1 }
 0x20c   : > { %1833 = vrsqrt.f32 %v1224_v2  ;;  %v1225_v4 = vadd.f32 1e-05, %v1221_v3 }
 0x20e   : > { %1835 = vrsqrt.f32 %v1225_v4 }
 0x219   : > { %v1834_v11 = vpop.eup %1833 }
 0x21a   : > { %v1232_v13 = vmul.f32 %v1834_v11, %v1188_v47 }
 0x21b   : > { %v1836_v12 = vpop.eup %1835 }
 0x21c   : > { %v1236_v8 = vmul.f32 %v1232_v13, %v1232_v13  ;;  %v1233_v14 = vmul.f32 %v1836_v12, %v1189_v50 }
 0x21e   : > { %v1240_v5 = vrot.slane %v1236_v8, 4  ;;  %v1237_v18 = vmul.f32 %v1233_v14, %v1233_v14 }
 0x220   : > { %v1241_v17 = vadd.f32 %v1240_v5, %v1236_v8  ;;  %v1246_v21 = vrot.slane %v1237_v18, 4 }
 0x222   : > { %v1242_v22 = vrot.slane %v1241_v17, 2  ;;  %v1247_v23 = vadd.f32 %v1246_v21, %v1237_v18 }
 0x224   : > { %v1243_v24 = vadd.f32 %v1242_v22, %v1241_v17  ;;  %v1248_v25 = vrot.slane %v1247_v23, 2 }
 0x226   : > { %v1244_v26 = vrot.slane %v1243_v24, 1  ;;  %v1249_v27 = vadd.f32 %v1248_v25, %v1247_v23 }
 0x228   : > { %v1245_v28 = vadd.f32 %v1244_v26, %v1243_v24  ;;  %v1250_v29 = vrot.slane %v1249_v27, 1  ;;  %v967_v30 = vpop.f32.mrf.mxu0 }
 0x229   : > { %v1038_v31 = vpop.f32.mrf.mxu1 }
 0x22a   : > { %v1264_v32 = vmax.f32 %v1245_v28, 1e-24  ;;  %v1039_v33 = vadd.f32 %v1038_v31, %v967_v30  ;;  %v1251_v34 = vadd.f32 %v1250_v29, %v1249_v27  ;;  %v969_v35 = vpop.f32.mrf.mxu0 }
 0x22b   : > { %v1040_v36 = vpop.f32.mrf.mxu1 }
 0x22c   : > { %v1172_v16 = vrot.slane %v1039_v33, 4  ;;  %v1041_v37 = vadd.f32 %v1040_v36, %v969_v35  ;;  %v1265_v38 = vmax.f32 %v1251_v34, 1e-24  ;;  %1837 = vrsqrt.f32 %v1264_v32 }
 0x22e   : > { %v1173_v6 = vadd.f32 %v1172_v16, %v1039_v33  ;;  %v1178_v10 = vrot.slane %v1041_v37, 4  ;;  %1839 = vrsqrt.f32 %v1265_v38 }
 0x230   : > { %v1174_v9 = vrot.slane %v1173_v6, 2  ;;  %v1179_v39 = vadd.f32 %v1178_v10, %v1041_v37 }
 0x232   : > { %v1175_v40 = vadd.f32 %v1174_v9, %v1173_v6  ;;  %v1180_v41 = vrot.slane %v1179_v39, 2 }
 0x234   : > { %v1176_v42 = vrot.slane %v1175_v40, 1  ;;  %v1181_v43 = vadd.f32 %v1180_v41, %v1179_v39 }
 0x236   : > { %v1177_v44 = vadd.f32 %v1176_v42, %v1175_v40  ;;  %v1182_v45 = vrot.slane %v1181_v43, 1 }
 0x238   : > { %v1186_v46 = vmul.f32 0.125, %v1177_v44  ;;  %v1183_v47 = vadd.f32 %v1182_v45, %v1181_v43 }
 0x239   : > { %v1838_v48 = vpop.eup %1837 }
 0x23a   : > { %v1190_v7 = vsub.f32 %v1039_v33, %v1186_v46  ;;  %v1187_v49 = vmul.f32 0.125, %v1183_v47  ;;  %v1272_v20 = vmul.f32 %v1838_v48, %v1232_v13 }
 0x23b   : > { %v1840_v50 = vpop.eup %1839 }
 0x23c   : > { %v1194_v54 = vmul.f32 %v1190_v7, %v1190_v7  ;;  %v1191_v19 = vsub.f32 %v1041_v37, %v1187_v49  ;;  %v1273_v55 = vmul.f32 %v1840_v50, %v1233_v14  ;;  %v1276_v34 = vmul.f32 %v1272_v20, %v3443_v15 }
 0x23e   : > { %v1208_v56 = vrot.slane %v1194_v54, 4  ;;  %v1195_v57 = vmul.f32 %v1191_v19, %v1191_v19  ;;  %1512 = vmatprep.subr.mxu0 %v1273_v55  ;;  %1546 = vmatprep.mubr.f32.mxu0 %v1273_v55  ;;  %v1277_v31 = vmul.f32 %v1273_v55, %v3441_v51  ;;  %v1280_v38 = vrot.slane %v1276_v34, 4 }
 0x23f   : > { %1513 = vmatpush1.xpose.msra.mxu0 %v1272_v20 }
 0x240   : > { %v1209_v58 = vadd.f32 %v1208_v56, %v1194_v54  ;;  %v1214_v59 = vrot.slane %v1195_v57, 4  ;;  %v1286_v16 = vrot.slane %v1277_v31, 4  ;;  %v1281_v9 = vadd.f32 %v1280_v38, %v1276_v34  ;;  %v1325_v38 = vld [vmem:[#allocation5] sm:$0x1] }
 0x242   : > { %v1210_v60 = vrot.slane %v1209_v58, 2  ;;  %v1215_v61 = vadd.f32 %v1214_v59, %v1195_v57  ;;  %1547 = vmatmul.mubr.f32.vlgmr.msra.gmra.mxu0 %v1272_v20  ;;  %v1287_v10 = vadd.f32 %v1286_v16, %v1277_v31  ;;  %v1282_v40 = vrot.slane %v1281_v9, 2 }
 0x244   : > { %v1211_v62 = vadd.f32 %v1210_v60, %v1209_v58  ;;  %v1216_v63 = vrot.slane %v1215_v61, 2  ;;  %v1288_v39 = vrot.slane %v1287_v10, 2  ;;  %v1283_v42 = vadd.f32 %v1282_v40, %v1281_v9  ;;  %v1481_v9 = vld [vmem:[#allocation3] sm:$0xff] }
 0x246   : > { %v1212_v0 = vrot.slane %v1211_v62, 1  ;;  %v1217_v1 = vadd.f32 %v1216_v63, %v1215_v61  ;;  %v1289_v41 = vadd.f32 %v1288_v39, %v1287_v10  ;;  %v1284_v48 = vrot.slane %v1283_v42, 1 }
 0x248   : > { %v1213_v2 = vadd.f32 %v1212_v0, %v1211_v62  ;;  %v1218_v3 = vrot.slane %v1217_v1, 1  ;;  %v1290_v44 = vrot.slane %v1289_v41, 1  ;;  %v1285_v55 = vadd.f32 %v1284_v48, %v1283_v42 }
 0x24a   : > { %v1222_v4 = vmul.f32 0.125, %v1213_v2  ;;  %v1219_v11 = vadd.f32 %v1218_v3, %v1217_v1  ;;  %v1291_v50 = vadd.f32 %v1290_v44, %v1289_v41 }
 0x24c   : > { %v1226_v12 = vadd.f32 1e-05, %v1222_v4  ;;  %v1223_v13 = vmul.f32 0.125, %v1219_v11  ;;  %v1305_v58 = vmul.f32 0.125, %v1291_v50 }
 0x24e   : > { %1841 = vrsqrt.f32 %v1226_v12  ;;  %v1227_v8 = vadd.f32 1e-05, %v1223_v13  ;;  %v1737_v63 = vadd.f32 -1.0, %v1305_v58 }
 0x250   : > { %1843 = vrsqrt.f32 %v1227_v8  ;;  %v1314_v4 = vmul.f32 %v1737_v63, %v1737_v63  ;;  %v1327_v8 = vmul.f32 %v1305_v58, %v1305_v58 }
 0x25b   : > { %v1842_v14 = vpop.eup %1841 }
 0x25c   : > { %v1234_v5 = vmul.f32 %v1842_v14, %v1190_v7 }
 0x25d   : > { %v1844_v18 = vpop.eup %1843 }
 0x25e   : > { %v1238_v17 = vmul.f32 %v1234_v5, %v1234_v5  ;;  %v1235_v21 = vmul.f32 %v1844_v18, %v1191_v19 }
 0x260   : > { %v1252_v22 = vrot.slane %v1238_v17, 4  ;;  %v1239_v23 = vmul.f32 %v1235_v21, %v1235_v21 }
 0x262   : > { %v1253_v24 = vadd.f32 %v1252_v22, %v1238_v17  ;;  %v1258_v25 = vrot.slane %v1239_v23, 4 }
 0x264   : > { %v1254_v26 = vrot.slane %v1253_v24, 2  ;;  %v1259_v27 = vadd.f32 %v1258_v25, %v1239_v23 }
 0x266   : > { %v1255_v28 = vadd.f32 %v1254_v26, %v1253_v24  ;;  %v1260_v29 = vrot.slane %v1259_v27, 2 }
 0x268   : > { %v1256_v30 = vrot.slane %v1255_v28, 1  ;;  %v1261_v32 = vadd.f32 %v1260_v29, %v1259_v27  ;;  %v1337_v29 = vld [vmem:[#allocation2] sm:$0xff] }
 0x26a   : > { %v1257_v33 = vadd.f32 %v1256_v30, %v1255_v28  ;;  %v1262_v35 = vrot.slane %v1261_v32, 1 }
 0x26c   : > { %v1266_v36 = vmax.f32 %v1257_v33, 1e-24  ;;  %v1263_v37 = vadd.f32 %v1262_v35, %v1261_v32 }
 0x26e   : > { %1845 = vrsqrt.f32 %v1266_v36  ;;  %v1267_v6 = vmax.f32 %v1263_v37, 1e-24  ;;  %v1308_v36 = vld [vmem:[#allocation4] sm:$0x1] }
 0x270   : > { %1847 = vrsqrt.f32 %v1267_v6 }
 0x27b   : > { %v1846_v43 = vpop.eup %1845 }
 0x27c   : > { %v1274_v51 = vmul.f32 %v1846_v43, %v1234_v5 }
 0x27d   : > { %v1848_v45 = vpop.eup %1847 }
 0x27e   : > { %v1275_v46 = vmul.f32 %v1848_v45, %v1235_v21  ;;  %v1278_v15 = vmul.f32 %v1274_v51, %v3451_v53  ;;  %v1404_v47 = vpop.f32.mrf.mxu0  ;;  %v1304_v53 = vmul.f32 0.125, %v1285_v55 }
 0x280   : > { %v1279_v7 = vmul.f32 %v1275_v46, %v3449_v52  ;;  %1582 = vmatprep.subr.mxu1 %v1275_v46  ;;  %1616 = vmatprep.mubr.f32.mxu1 %v1275_v46  ;;  %v1406_v49 = vpop.f32.mrf.mxu0  ;;  %v1292_v54 = vrot.slane %v1278_v15, 4  ;;  %v1736_v1 = vadd.f32 -1.0, %v1304_v53  ;;  %v1326_v14 = vmul.f32 %v1304_v53, %v1304_v53 }
 0x281   : > { %1583 = vmatpush1.xpose.msra.mxu1 %v1274_v51 }
 0x282   : > { %v1298_v19 = vrot.slane %v1279_v7, 4  ;;  %v1293_v20 = vadd.f32 %v1292_v54, %v1278_v15  ;;  %v1313_v13 = vmul.f32 %v1736_v1, %v1736_v1  ;;  %v1330_v24 = vadd.f32 %v1327_v8, %v1326_v14 }
 0x284   : > { %1617 = vmatmul.mubr.f32.vlgmr.msra.gmra.mxu1 %v1274_v51  ;;  %v1294_v56 = vrot.slane %v1293_v20, 2  ;;  %v1299_v57 = vadd.f32 %v1298_v19, %v1279_v7  ;;  %v1317_v17 = vadd.f32 %v1314_v4, %v1313_v13 }
 0x286   : > { %v1295_v59 = vadd.f32 %v1294_v56, %v1293_v20  ;;  %v1300_v60 = vrot.slane %v1299_v57, 2 }
 0x288   : > { %v1296_v61 = vrot.slane %v1295_v59, 1  ;;  %v1301_v62 = vadd.f32 %v1300_v60, %v1299_v57 }
 0x28a   : > { %v1297_v52 = vadd.f32 %v1296_v61, %v1295_v59  ;;  %v1302_v0 = vrot.slane %v1301_v62, 1 }
 0x28c   : > { %v1303_v2 = vadd.f32 %v1302_v0, %v1301_v62  ;;  %v1306_v3 = vmul.f32 0.125, %v1297_v52 }
 0x28e   : > { %v1307_v11 = vmul.f32 0.125, %v1303_v2  ;;  %v1738_v12 = vadd.f32 -1.0, %v1306_v3  ;;  %v1328_v21 = vmul.f32 %v1306_v3, %v1306_v3 }
 0x290   : > { %v1739_v5 = vadd.f32 -1.0, %v1307_v11  ;;  %v1315_v18 = vmul.f32 %v1738_v12, %v1738_v12  ;;  %v1329_v26 = vmul.f32 %v1307_v11, %v1307_v11  ;;  %v1331_v27 = vadd.f32 %v1330_v24, %v1328_v21 }
 0x292   : > { %v1316_v22 = vmul.f32 %v1739_v5, %v1739_v5  ;;  %v1318_v23 = vadd.f32 %v1317_v17, %v1315_v18  ;;  %v1332_v28 = vadd.f32 %v1331_v27, %v1329_v26 }
 0x294   : > { %v1319_v25 = vadd.f32 %v1318_v23, %v1316_v22 }
 0x296   : > { %1320 = vadd.xlane.f32.xlu0 %v1319_v25 }
 0x29a   : > { %1333 = vadd.xlane.f32.xlu0 %v1332_v28 }
 0x2c0   : > { %v1474_v30 = vpop.f32.mrf.mxu1 }
 0x2c1   : > { %v1475_v31 = vadd.f32 %v1474_v30, %v1404_v47 }
 0x2c2   : > { %v1476_v32 = vpop.f32.mrf.mxu1 }
 0x2c3   : > { %v1478_v33 = vadd.f32 %v1475_v31, %v1337_v29 }
 0x2c5   : > { %1480 = vst.msk [vmem:[#allocation2] sm:$0xff] %vm1479_vm2, %v1478_v33 }
 0x302   : > { %v1548_v34 = vpop.f32.mrf.mxu0 }
 0x304   : > { %v1550_v35 = vpop.f32.mrf.mxu0 }
 0x31f   : > { %v1321_v16 = vpop.xlane.xlu0 %1320 }
 0x320   : > { %v1322_v37 = vadd.f32 %v1321_v16, %v1308_v36 }
 0x322   : > { %1324 = vst.msk [vmem:[#allocation4] sm:$0x1] %vm1323_vm3, %v1322_v37 }
 0x323   : > { %v1334_v6 = vpop.xlane.xlu0 %1333 }
 0x324   : > { %v1335_v10 = vadd.f32 %v1334_v6, %v1325_v38 }
 0x326   : > { %1336 = vst.msk [vmem:[#allocation5] sm:$0x1] %vm1323_vm3, %v1335_v10 }
 0x344   : > { %v1618_v39 = vpop.f32.mrf.mxu1 }
 0x345   : > { %v1619_v40 = vadd.f32 %v1618_v39, %v1548_v34  ;;  %1627 = sbr.rel (%p1740_p11) target bundleno = 1011 (0x3f3), region = 52 }
 0x346   : > { %v1620_v41 = vpop.f32.mrf.mxu1 }
 0x347   : > { %v1622_v42 = vadd.f32 %v1619_v40, %v1481_v9 }
 0x349   : > { %1623 = vst.msk [vmem:[#allocation3] sm:$0xff] %vm1479_vm2, %v1622_v42 }
 0x34a   : > { %v1628_v43 = vld [vmem:[#allocation2] sm:$0xff]  ;;  %v1641_v54 = vld [vmem:[#allocation5] sm:$0x1]  ;;  %v1643_v20 = vld [vmem:[#allocation4] sm:$0x1] }
 0x350   : > { %v1629_v51 = vld [vmem:[#allocation3] sm:$0xff] }
 0x351   : > { %v1630_v44 = vmul.f32 %v1629_v51, %v1628_v43 }
 0x353   : > { %v1631_v45 = vsel %vm1479_vm2, %v1630_v44, 0.0 }
 0x354   : > { %1632 = vadd.xlane.f32.xlu0 %v1631_v45 }
 0x3dd   : > { %v1633_v46 = vpop.xlane.xlu0 %1632 }
 0x3de   : > { %v1634_v15 = vrot.slane %v1633_v46, 4 }
 0x3e0   : > { %v1635_v47 = vadd.f32 %v1634_v15, %v1633_v46 }
 0x3e2   : > { %v1636_v48 = vrot.slane %v1635_v47, 2 }
 0x3e4   : > { %v1637_v7 = vadd.f32 %v1636_v48, %v1635_v47 }
 0x3e6   : > { %v1638_v49 = vrot.slane %v1637_v7, 1 }
 0x3e8   : > { %v1639_v50 = vadd.f32 %v1638_v49, %v1637_v7 }
 0x3ea   : > { %v1640_v19 = vmul.f32 0.015625, %v1639_v50 }
 0x3ec   : > { %v1642_v55 = vsub.f32 %v1640_v19, %v1641_v54 }
 0x3ee   : > { %v1644_v56 = vmul.f32 0.005, %v1642_v55 }
 0x3f0   : > { %v1645_v57 = vadd.f32 %v1644_v56, %v1643_v20 }
 0x3f2   : > { %1646 = vst.msk [vmem:[#allocation12] sm:$0x1] %vm1323_vm3, %v1645_v57 }
 0x3f3 PF: > { %p1776_p4 = scmp.eq.s32.totalorder %s2066_s16, 3  ;;  %s2026_s22 = smov [#allocation12]  }
 0x3f4   : > { %s1654_s24 = sshll.u32 %s2026_s22, 4  ;;  %s1655_s24 = int_to_ptr.vmem [resolvable:$true] %s1654_s24 }
 0x3f5   : > { %s1947_s25 = scalar_lea.vmem %s1655_s24, 16  ;;  %s1953_s26 = scalar_lea.vmem %s1655_s24, 32 }
 0x3f6   : > { %p1948_p12 = scmp.ne.s32.totalorder %s1655_s24, %s1947_s25  ;;  %p1954_p5 = scmp.lt.s32.totalorder %s1655_s24, %s1655_s24 }
 0x3f7   : > { %p1955_p10 = scmp.lt.s32.totalorder %s1953_s26, %s1947_s25 }
 0x3f8   : > { %p1949_p2 = pnand %p1948_p12, %p1776_p4 }
 0x3f9   : > { %p1956_p9 = por %p1955_p10, %p1954_p5 }
 0x3fa   : > { %p1950_p3 = pneg %p1949_p2 }
 0x3fc   : > { %p1957_p13 = pnand %p1956_p9, %p1950_p3 }
 0x3fe   : > { %1960 = shalt.err (!%p1957_p13)
}
 0x3ff   : > { %1757 = dma.vmem_to_hbm [thread:$0]  (%p1776_p4), %s1655_s24, 16, %s3496_s3, [#allocation8]  }
 0x400   : > { %2000 = dma.done.wait (%p1776_p4), [#allocation8], 16  }
 0x401   : > { %2002 = vsyncadd (%p1776_p4), [#allocation8], 4294967280 }
 0x402 PF: > { %p13_p0 = scmp.ge.s32.totalorder %s2069_s17, 6   ;;  %s4066_s12 = smov %s2009_s13 }
 0x403   : > { %s4067_s13 = smov %s2013_s14  ;;  %s4068_s14 = smov %s2079_s20 }
 0x404   : > { %s4069_s15 = smov %s2069_s17  ;;  %15 = sbr.rel (!%p13_p0) target bundleno = 4 (0x4), region = 84 }
 0x409   :  { %1667 = vsyncpa [#allocation7], 1 }
 0x40a   :  { %1669 = vsyncpa [#allocation7 + $0x1], 1 }
 0x40b   :  { %1670 = vsyncpa [#allocation10], 1 }
 0x40c   :  { %1671 = vsyncpa [#allocation8], 1 }
 0x40d   :  { %1673 = vsyncpa [#allocation8 + $0x1], 1 }

</bundles_post_ra>
